<compile_context>
chip_gen: v7x
topology: tpu7x:2x2x1
jax: 0.10.0
libtpu: 0.0.40
codegen_flags: <defaults>
</compile_context>

<pallas_src>
import math

import jax
import jax.numpy as jnp
from jax.experimental import pallas as pl
from jax.experimental.pallas import tpu as pltpu


def _layer_scale_kernel(x_ref, g_ref, o_ref):
    # x_ref: (TM, TC) tile; g_ref: (1, TC) gamma row (VMEM-resident when the
    # column grid has a single block).  Sublane-broadcast multiply on the VPU.
    o_ref[...] = x_ref[...] * g_ref[...]


def _vmem_capacity_bytes() -> int:
    """Physical per-core VMEM; conservative (v7x 64 MiB) if the query fails."""
    try:
        info = pltpu.get_tpu_info()
        cap = int(getattr(info, "vmem_capacity_bytes", 0))
        if cap >= (32 << 20):
            return cap
    except Exception:
        pass
    return 64 << 20


def layer_scale(x: jax.Array, gamma: jax.Array, *, donate_x: bool = False) -> jax.Array:
    """y = x * gamma with gamma (D,) broadcast over all leading axes of x."""
    orig_shape = x.shape
    D = orig_shape[-1]
    assert gamma.shape == (D,), f"gamma must be ({D},), got {gamma.shape}"

    # Cast once in the wrapper (no per-tile convert inside the kernel; matters
    # on v5e which has no bf16 VPU path).  Matches timm when run in bf16.
    gamma = gamma.astype(x.dtype)

    itemsize = jnp.dtype(x.dtype).itemsize
    total_elems = math.prod(orig_shape)
    total_bytes = total_elems * itemsize

    # Tiny inputs: fixed Mosaic launch + single-step pipeline overhead would
    # dominate a sub-microsecond op; plain XLA fuses it for free.
    if total_bytes < (256 << 10):
        return x * gamma

    rows = total_elems // D

    # ---- Lane-dense layout -------------------------------------------------
    # gamma's broadcast over rows is periodic with period D along the
    # flattened array, so folding k rows into the lane axis and tiling gamma
    # k times is exactly equivalent.  Pick the fold so the last dim is a wide
    # multiple of 128 (unmasked full-width stores, few grid steps).
    sublane = max(8, 32 // itemsize)          # 8 (4B), 16 (2B), 32 (1B dtypes)
    base_k = 128 // math.gcd(D, 128)          # smallest fold with cols % 128 == 0
    if rows % base_k == 0:
        cols_unit = base_k * D
        fold = 1
        # Widen toward ~2K-8K lanes while the fold still divides the row count
        # and leaves enough folded rows for a multi-step grid.
        while (cols_unit * fold * 2 <= 8192
               and rows % (base_k * fold * 2) == 0
               and (total_elems // (cols_unit * fold * 2)) >= 2 * sublane):
            fold *= 2
        cols = cols_unit * fold
    else:
        # TODO(synk): padding rows to a multiple of base_k would recover
        # lane-dense stores here, but the pad itself is a full HBM copy on a
        # bandwidth-bound op; fall back to the natural layout instead.
        cols = D
    folded_rows = total_elems // cols
    x2 = x.reshape(folded_rows, cols)                       # bitcast, free
    g2 = jnp.tile(gamma, cols // D).reshape(1, cols)        # tiny

    # ---- Tile / VMEM budget (generation aware) -----------------------------
    # Pure HBM-bandwidth-bound: biggest tiles whose pipelined footprint
    # (2 in + 2 out buffers + resident gamma) fits the smallest VMEM (v7x).
    vmem_bytes = _vmem_capacity_bytes()
    pipeline_budget = min(vmem_bytes * 3 // 4, 96 << 20)
    max_tile_bytes = min(pipeline_budget // 4, 8 << 20)

    if cols % 128 == 0:
        # Column tiling is a safety net for enormous D; normally tc == cols.
        tc_cap = max(128, ((max_tile_bytes // (sublane * itemsize)) // 128) * 128)
        tc = min(cols, tc_cap)
    else:
        tc = cols                              # full-extent last dim (fallback)
    n_col = pl.cdiv(cols, tc)

    tm = max(sublane, ((max_tile_bytes // (tc * itemsize)) // sublane) * sublane)
    tm = min(tm, folded_rows)
    if folded_rows < sublane:
        tm = folded_rows                       # full-extent block is layout-legal

    # v7x megacore: ensure >= 2 (ideally 4) balanced row steps on the
    # "parallel" grid axis so both TensorCores participate.
    if n_col == 1 and folded_rows >= 2 * sublane:
        min_steps = 4 if folded_rows >= 4 * sublane else 2
        if pl.cdiv(folded_rows, tm) < min_steps:
            tm = max(sublane,
                     pl.cdiv(pl.cdiv(folded_rows, min_steps), sublane) * sublane)

    n_row = pl.cdiv(folded_rows, tm)
    grid = (n_row, n_col)

    tile_bytes = tm * tc * itemsize
    vmem_limit = int(min(vmem_bytes - (8 << 20),
                         max(32 << 20,
                             4 * tile_bytes + 2 * cols * itemsize + (4 << 20))))

    out2 = pl.pallas_call(
        _layer_scale_kernel,
        out_shape=jax.ShapeDtypeStruct((folded_rows, cols), x.dtype),
        grid=grid,
        in_specs=[
            pl.BlockSpec((tm, tc), lambda i, j: (i, j)),
            # Row index constant; when n_col == 1 the whole index is constant,
            # so gamma stays resident in VMEM (one DMA total).
            pl.BlockSpec((1, tc), lambda i, j: (0, j)),
        ],
        out_specs=pl.BlockSpec((tm, tc), lambda i, j: (i, j)),
        compiler_params=pltpu.CompilerParams(
            dimension_semantics=("parallel", "parallel"),
            vmem_limit_bytes=vmem_limit,
        ),
        cost_estimate=pl.CostEstimate(
            flops=total_elems,
            transcendentals=0,
            bytes_accessed=2 * total_bytes + cols * itemsize,
        ),
        # timm `inplace=True` flavor: reuse x's HBM buffer for the output.
        input_output_aliases=({0: 0} if donate_x else {}),
    )(x2, g2)

    return out2.reshape(orig_shape)


if __name__ == "__main__":
    init_values = 1e-5
    key = jax.random.PRNGKey(0)
    k1, k2, k3, k4 = jax.random.split(key, 4)

    # --- 1) Small module-consistent demo (batch, tokens, dim): fast path. ---
    B, N, Dm = 2, 8, 32
    gamma_s = jnp.full((Dm,), init_values, dtype=jnp.float32)
    x_s = jax.random.normal(k1, (B, N, Dm), dtype=jnp.float32)
    y_s = layer_scale(x_s, gamma_s)
    jax.block_until_ready(y_s)
    assert y_s.shape == x_s.shape and y_s.dtype == x_s.dtype
    assert jnp.allclose(y_s, x_s * gamma_s, atol=1e-6, rtol=1e-6)

    # --- 2) f32, D multiple of 128: lane-fold widens to ~6K lanes, 4 steps. ---
    D2 = 384
    gamma2 = jnp.full((D2,), init_values, dtype=jnp.float32)
    x2 = jax.random.normal(k2, (8, 512, D2), dtype=jnp.float32)
    y2 = layer_scale(x2, gamma2)
    jax.block_until_ready(y2)
    assert jnp.allclose(y2, x2 * gamma2, atol=1e-6, rtol=1e-6)

    # --- 3) bf16, D=32: fold to 8192-lane rows, 2-step grid. ---
    D3 = 32
    gamma3 = jnp.full((D3,), init_values, dtype=jnp.float32)
    x3 = jax.random.normal(k3, (8, 1024, D3), dtype=jnp.bfloat16)
    y3 = layer_scale(x3, gamma3)
    jax.block_until_ready(y3)
    y3_ref = x3 * gamma3.astype(jnp.bfloat16)
    assert y3.dtype == jnp.bfloat16
    assert jnp.allclose(
        y3.astype(jnp.float32), y3_ref.astype(jnp.float32), atol=1e-6, rtol=1e-2
    )

    # --- 4) Ragged row count: last grid step is a masked boundary tile. ---
    x4 = jax.random.normal(k4, (2, 375, D2), dtype=jnp.float32)
    y4 = layer_scale(x4, gamma2)
    jax.block_until_ready(y4)
    assert jnp.allclose(y4, x4 * gamma2, atol=1e-6, rtol=1e-6)

    print("KERNEL_OK")
</pallas_src>

<mosaic_0001>
module attributes {stable_mosaic.version = 11 : i64} {
  func.func @_layer_scale_kernel(%arg0: i32, %arg1: i32, %arg2: memref<64x6144xf32, #tpu.memory_space<vmem>>, %arg3: memref<1x6144xf32, #tpu.memory_space<vmem>>, %arg4: memref<64x6144xf32, #tpu.memory_space<vmem>>) attributes {dimension_semantics = [#tpu.dimension_semantics<parallel>, #tpu.dimension_semantics<parallel>], iteration_bounds = array<i64: 4, 1>, scalar_prefetch = 0 : i64, scratch_operands = 0 : i64, tpu.core_type = #tpu.core_type<tc>, window_params = [{transform_indices = @transform_0, window_bounds = array<i64: 64, 6144>}, {transform_indices = @transform_1, window_bounds = array<i64: 1, 6144>}, {transform_indices = @transform_2, window_bounds = array<i64: 64, 6144>}]} {
    %c0 = arith.constant 0 : index
    %c0_0 = arith.constant 0 : index
    %0 = vector.load %arg2[%c0, %c0_0] : memref<64x6144xf32, #tpu.memory_space<vmem>>, vector<64x6144xf32>
    %c0_1 = arith.constant 0 : index
    %c0_2 = arith.constant 0 : index
    %1 = vector.load %arg3[%c0_1, %c0_2] : memref<1x6144xf32, #tpu.memory_space<vmem>>, vector<1x6144xf32>
    %2 = vector.broadcast %1 : vector<1x6144xf32> to vector<64x6144xf32>
    %3 = arith.mulf %0, %2 : vector<64x6144xf32>
    %c0_3 = arith.constant 0 : index
    %c0_4 = arith.constant 0 : index
    %4 = vector.load %arg4[%c0_3, %c0_4] : memref<64x6144xf32, #tpu.memory_space<vmem>>, vector<64x6144xf32>
    tpu.vector_store %arg4[%c0_3, %c0_4], %3 {strides = array<i32>} : memref<64x6144xf32, #tpu.memory_space<vmem>>, vector<64x6144xf32>,
    return
  }
  func.func @transform_0(%arg0: i32, %arg1: i32) -> (i32, i32) {
    %c0_i32 = arith.constant 0 : i32
    return %arg0, %arg1 : i32, i32
  }
  func.func @transform_1(%arg0: i32, %arg1: i32) -> (i32, i32) {
    %c0_i32 = arith.constant 0 : i32
    %c0_i32_0 = arith.constant 0 : i32
    return %c0_i32, %arg1 : i32, i32
  }
  func.func @transform_2(%arg0: i32, %arg1: i32) -> (i32, i32) {
    %c0_i32 = arith.constant 0 : i32
    return %arg0, %arg1 : i32, i32
  }
}

</mosaic_0001>

<bundles_post_ra>
// kernel: tpu_custom_call.1
= control target key start
LH: loop header
LB: loop body
LE: loop exit
PB: predicated region body
PF: predicated region fallthrough
CT: control target
= control target key end

     0   :  { %7 = vsyncpa [#allocation3], 0  ;;  %s3535_s0 = inlined_call_operand.hbm [shape: f32[256,6144], index: 0, kind: input, shape index: {}]   ;;  %s3536_s1 = inlined_call_operand.hbm [shape: f32[1,6144], index: 1, kind: input, shape index: {}]   ;;  %s3537_s2 = inlined_call_operand.hbm [shape: f32[256,6144], index: 2, kind: output, shape index: {}]  }
   0x1   :  { %9 = vsyncpa [#allocation3 + $0x1], 0 }
   0x2   :  { %10 = vsyncpa [#allocation6], 0 }
   0x3   :  { %11 = vsyncpa [#allocation4], 0 }
   0x4   :  { %13 = vsyncpa [#allocation4 + $0x1], 0  ;;  %s1991_s9 = smov 0   ;;  %s1993_s10 = smov 0  }
   0x5   :  { %s1995_s11 = smov 0   ;;  %s1997_s12 = smov 0  }
   0x6   :  { %s1999_s13 = smov 0   ;;  %s2001_s14 = smov 0  }
   0x7 LB: > { %s1727_s15 = sadd.s32 4294967295, %s1967_s14   ;;  %s1728_s16 = sadd.s32 4294967294, %s1967_s14   ;;  %s1967_s14 = sphi %s2001_s14, %s19_s14   ;;  %s1963_s13 = sphi %s1999_s13, %s3644_s13   ;;  %s1959_s12 = sphi %s1997_s12, %s3643_s12   ;;  %s1955_s11 = sphi %s1995_s11, %s3642_s11   ;;  %s1951_s10 = sphi %s1993_s10, %s3641_s10   ;;  %s1947_s9 = sphi %s1991_s9, %s3640_s9  }
   0x8   : > { %s40_s17 = sadd.s32 1, %s1955_s11  ;;  %p47_p0 = scmp.ne.s32.totalorder %s1955_s11, %s1951_s10 }
   0x9   : > { %p48_p1 = scmp.eq.s32.totalorder %s1967_s14, 0  ;;  %p53_p2 = scmp.ne.s32.totalorder %s1951_s10, %s1947_s9 }
   0xa   : > { %p2029_p3 = scmp.eq.s32.totalorder %s1727_s15, 0  ;;  %p105_p4 = scmp.eq.s32.totalorder %s1727_s15, 3 }
   0xb   : > { %p2033_p5 = por %p48_p1, %p47_p0  ;;  %p111_p6 = scmp.eq.s32.totalorder %s1728_s16, 3 }
   0xc   : > { %s3580_s18 = scalar_select %p2029_p3, 1, 0 }
   0xd   : > { %p2039_p7 = por %p2029_p3, %p53_p2  ;;  %p2043_p8 = por %p105_p4, %p47_p0 }
   0xe   : > { %p2047_p9 = por %p111_p6, %p53_p2  ;;  %p1729_p10 = scmp.ge.s32.totalorder %s1967_s14, 1 }
   0xf   : > { %s3582_s20 = scalar_select %p2039_p7, 1, 0 }
  0x10   : > { %s3583_s21 = scalar_select %p2043_p8, 1, 0 }
  0x11   : > { %s3584_s22 = scalar_select %p2047_p9, 1, 0 }
  0x12   : > { %p118_p11 = scmp.lt.s32.totalorder %s1967_s14, 5  ;;  %s1969_s24 = smov [#allocation5]  }
  0x13   : > { %s134_s25 = sshll.u32 %s1969_s24, 4  ;;  %p1767_p13 = scmp.lt.s32.totalorder %s1967_s14, 4  ;;  %s135_s25 = int_to_ptr.vmem [resolvable:$true] %s134_s25 }
  0x14   : > { %p2053_p12 = pnand %p1729_p10, %p118_p11  ;;  %s31_s28 = sadd.s32 1, %s1963_s13 }
  0x15   : > { %p2062_p1 = pnand %p1767_p13, %p2033_p5  ;;  %p2073_p4 = scmp.ge.s32.totalorder %s31_s28, 4 }
  0x16   : > { %s3585_s23 = scalar_select %p2053_p12, 1, 0 }
  0x17   : > { %p1754_p0 = pneg %p2053_p12  ;;  %s145_s30 = sand.u32 1, %s1955_s11  }
  0x18   : > { %s3586_s26 = scalar_select %p2062_p1, 1, 0 }
  0x19   : > { %p2068_p2 = pnand %p1754_p0, %p2029_p3  ;;  %s1823_s5 = scalar_lea.hbm %s3536_s1, 768 }
  0x1a   : > { %s3588_s29 = scalar_select %p2073_p4, 1, 0 }
  0x1b   : > { %p1824_p5 = scmp.ne.s32.totalorder %s3536_s1, %s1823_s5  ;;  %p1825_p6 = pneg %p2068_p2 }
  0x1c   : > { %p1830_p13 = scmp.lt.u32.totalorder %s1823_s5, %s3536_s1 }
  0x1d   : > { %p1826_p10 = pnand %p1825_p6, %p1824_p5 }
  0x1f   : > { %p1827_p11 = pneg %p1826_p10 }
  0x21   : > { %p1832_p0 = pnand %p1830_p13, %p1827_p11 }
  0x23   : > { %1835 = shalt.err (!%p1832_p0)
}
  0x24   : > { %s1836_s16 = scalar_lea.vmem %s135_s25, 768  ;;  %p1844_p7 = scmp.lt.s32.totalorder %s135_s25, %s135_s25 }
  0x25   : > { %p1837_p9 = scmp.ne.s32.totalorder %s135_s25, %s1836_s16  ;;  %p1845_p12 = scmp.lt.s32.totalorder %s1836_s16, %s1836_s16 }
  0x27   : > { %p1839_p8 = pnand %p1837_p9, %p1825_p6  ;;  %p1846_p1 = por %p1845_p12, %p1844_p7 }
  0x29   : > { %p1840_p3 = pneg %p1839_p8 }
  0x2b   : > { %p1847_p4 = pnand %p1846_p1, %p1840_p3 }
  0x2d   : > { %1850 = shalt.err (!%p1847_p4)
}
  0x2e   : > { %1757 = dma.hbm_to_vmem [thread:$0]  (!%p2068_p2), %s3536_s1, 768, %s135_s25, [#allocation6]  }
  0x2f   : > { %p3589_p9 = scmp.ne.s32.totalorder %s3588_s29, 0  ;;  %s1742_s3 = smul.u32 3072, %s145_s30 }
  0x30   : > { %s1743_s5 = smul.u32 49152, %s1963_s13  ;;  %s2113_s29 = scalar_lea.sflag [#allocation3], %s145_s30 }
  0x31   : > { %s3646_s28 = smov (%p3589_p9, %s31_s28), 0  ;;  %s149_s8 = scalar_lea.vmem [#allocation2], %s1742_s3 }
  0x32   : > { %s35_s4 = ssub.s32 %s1963_s13, %s3646_s28  ;;  %s2104_s7 = scalar_lea.hbm %s3535_s0, %s1743_s5 }
  0x33   : > { %p38_p3 = scmp.eq.s32.totalorder %s35_s4, 0  ;;  %s159_s15 = sshll.u32 %s149_s8, 4  ;;  %s2111_s15 = int_to_ptr.vmem [resolvable:$true] %s159_s15 }
  0x34   : > { %s1851_s16 = scalar_lea.hbm %s2104_s7, 49152  ;;  %p3590_p8 = scmp.ne.s32.totalorder %s3586_s26, 0 }
  0x35   : > { %s2109_s25 = scalar_select %p38_p3, %s1955_s11, %s40_s17  }
  0x36   : > { %p1852_p7 = scmp.ne.s32.totalorder %s2104_s7, %s1851_s16  ;;  %p1853_p12 = pneg %p3590_p8 }
  0x37   : > { %s1856_s3 = scalar_lea.hbm %s3535_s0, 196608  ;;  %p1857_p4 = scmp.lt.u32.totalorder %s2104_s7, %s3535_s0 }
  0x38   : > { %p1854_p1 = pnand %p1853_p12, %p1852_p7  ;;  %p1858_p5 = scmp.lt.u32.totalorder %s1856_s3, %s1851_s16 }
  0x39   : > { %p1860_p10 = scmp.lt.u32.totalorder %s1851_s16, %s2104_s7 }
  0x3a   : > { %p1855_p2 = pneg %p1854_p1  ;;  %p1859_p6 = por %p1858_p5, %p1857_p4 }
  0x3c   : > { %p1861_p11 = por %p1860_p10, %p1859_p6 }
  0x3e   : > { %p1862_p13 = pnand %p1861_p11, %p1855_p2 }
  0x40   : > { %1865 = shalt.err (!%p1862_p13)
}
  0x41   : > { %s1866_s17 = scalar_lea.vmem %s2111_s15, 49152  ;;  %s1970_s30 = smov [#allocation2]  }
  0x42   : > { %p1867_p0 = scmp.ne.s32.totalorder %s2111_s15, %s1866_s17  ;;  %s1871_s27 = sshll.u32 %s1970_s30, 4  ;;  %s1872_s27 = int_to_ptr.vmem [resolvable:$false] %s1871_s27 }
  0x43   : > { %s1873_s6 = scalar_lea.vmem %s1872_s27, 98304  ;;  %p1874_p7 = scmp.lt.s32.totalorder %s2111_s15, %s1872_s27 }
  0x44   : > { %p1869_p9 = pnand %p1867_p0, %p1853_p12  ;;  %p1875_p1 = scmp.lt.s32.totalorder %s1873_s6, %s1866_s17 }
  0x46   : > { %p1870_p3 = pneg %p1869_p9  ;;  %p1876_p4 = por %p1875_p1, %p1874_p7 }
  0x48   : > { %p1877_p5 = pnand %p1876_p4, %p1870_p3 }
  0x4a   : > { %1880 = shalt.err (!%p1877_p5)
}
  0x4b   : > { %s1971_s8 = smov 6144   ;;  %s1972_s16 = smov 384  }
  0x4c   : > { %1761 = dma.hbm_to_vmem [thread:$0]  (!%p3590_p8), %s2104_s7, 49152, %s2111_s15, %s2113_s29, %s1971_s8, %s1971_s8, %s1972_s16  }
  0x4d   : > { %p3591_p12 = scmp.ne.s32.totalorder %s3585_s23, 0 }
  0x4f   : > { %171 = sbr.rel (%p3591_p12) target bundleno = 323 (0x143), region = 28 }
  0x56   : > { %s2144_s19 = sand.u32 1, %s1951_s10   ;;  %p3592_p2 = scmp.ne.s32.totalorder %s3582_s20, 0 }
  0x57   : > { %s1744_s24 = smul.u32 3072, %s2144_s19  ;;  %s174_s3 = scalar_lea.sflag [#allocation3], %s2144_s19 }
  0x59   : > { %s2150_s4 = scalar_lea.vmem [#allocation2], %s1744_s24 }
  0x5a   : > { %1934 = dma.done.wait (%p3592_p2), %s174_s3, 49152  }
  0x5b   : > { %1936 = vsyncadd (%p3592_p2), %s174_s3, 4294918144  ;;  %p3593_p8 = scmp.ne.s32.totalorder %s3580_s18, 0 }
  0x5d   : > { %1938 = dma.done.wait (%p3593_p8), [#allocation6], 768  }
  0x5e   : > { %1940 = vsyncadd (%p3593_p8), [#allocation6], 4294966528  ;;  %v603_v0 = vlaneseq  ;;  %v207_v10 = vld [vmem:[%s2150_s4] sm:$0xff]  ;;  %v208_v12 = vld [vmem:[%s2150_s4 + $0x8] sm:$0xff]  ;;  %s2223_s18 = scalar_lea.vmem [#allocation7], %s1744_s24  ;;  %s1745_s20 = smul.u32 49152, %s1959_s12 }
  0x5f   : > { %v591_v11 = vld [vmem:[#allocation5] sm:$0xff]  ;;  %v209_v15 = vld [vmem:[%s2150_s4 + $0x10] sm:$0xff]  ;;  %v210_v17 = vld [vmem:[%s2150_s4 + $0x18] sm:$0xff]  ;;  %s1628_s23 = sshll.u32 %s2223_s18, 4  ;;  %s1612_s12 = scalar_lea.sflag [#allocation4], %s2144_s19  ;;  %s3475_s23 = int_to_ptr.vmem [resolvable:$true] %s1628_s23 }
  0x60   : > { %v604_v1 = vshrl.u32 %v603_v0, 7  ;;  %v211_v19 = vld [vmem:[%s2150_s4 + $0x20] sm:$0xff]  ;;  %v212_v21 = vld [vmem:[%s2150_s4 + $0x28] sm:$0xff]  ;;  %v213_v23 = vld [vmem:[%s2150_s4 + $0x30] sm:$0xff]  ;;  %s3471_s15 = scalar_lea.hbm %s3537_s2, %s1745_s20  ;;  %s1881_s29 = scalar_lea.vmem %s3475_s23, 49152 }
  0x61   : > { %v214_v25 = vld [vmem:[%s2150_s4 + $0x38] sm:$0xff]  ;;  %v215_v31 = vld [vmem:[%s2150_s4 + $0x40] sm:$0xff]  ;;  %v592_v32 = vld [vmem:[#allocation5 + $0x8] sm:$0xff]  ;;  %p1882_p6 = scmp.ne.s32.totalorder %s3475_s23, %s1881_s29  ;;  %p3638_p10 = scmp.ne.s32.totalorder %s3583_s21, 0 }
  0x62   : > { %v2160_v2 = vsub.s32 0, %v604_v1  ;;  %v2162_v3 = vsub.s32 1, %v604_v1  ;;  %v2164_v4 = vsub.s32 2, %v604_v1  ;;  %v2166_v5 = vsub.s32 3, %v604_v1  ;;  %v216_v33 = vld [vmem:[%s2150_s4 + $0x48] sm:$0xff]  ;;  %v217_v38 = vld [vmem:[%s2150_s4 + $0x50] sm:$0xff] }
  0x63   : > { %v2168_v6 = vsub.s32 4, %v604_v1  ;;  %v2170_v7 = vsub.s32 5, %v604_v1  ;;  %v2172_v8 = vsub.s32 6, %v604_v1  ;;  %v2174_v9 = vsub.s32 7, %v604_v1  ;;  %v218_v39 = vld [vmem:[%s2150_s4 + $0x58] sm:$0xff]  ;;  %v219_v40 = vld [vmem:[%s2150_s4 + $0x60] sm:$0xff]  ;;  %p1883_p11 = pnand %p1882_p6, %p3638_p10 }
  0x64   : > { %v2179_v13 = vrot.slane %v591_v11, %v2160_v2  ;;  %v2182_v14 = vrot.slane %v591_v11, %v2162_v3  ;;  %v2186_v16 = vrot.slane %v591_v11, %v2164_v4  ;;  %v2190_v18 = vrot.slane %v591_v11, %v2166_v5  ;;  %v220_v45 = vld [vmem:[%s2150_s4 + $0x68] sm:$0xff]  ;;  %v221_v46 = vld [vmem:[%s2150_s4 + $0x70] sm:$0xff]  ;;  %v222_v47 = vld [vmem:[%s2150_s4 + $0x78] sm:$0xff]  ;;  %s1973_s5 = smov [#allocation7]  }
  0x65   : > { %v2194_v20 = vrot.slane %v591_v11, %v2168_v6  ;;  %v2198_v22 = vrot.slane %v591_v11, %v2170_v7  ;;  %v2202_v24 = vrot.slane %v591_v11, %v2172_v8  ;;  %v2206_v26 = vrot.slane %v591_v11, %v2174_v9  ;;  %v593_v52 = vld [vmem:[#allocation5 + $0x10] sm:$0xff]  ;;  %v223_v57 = vld [vmem:[%s2150_s4 + $0x80] sm:$0xff]  ;;  %v224_v58 = vld [vmem:[%s2150_s4 + $0x88] sm:$0xff]  ;;  %p1884_p13 = pneg %p1883_p11  ;;  %s1885_s17 = sshll.u32 %s1973_s5, 4  ;;  %s1886_s17 = int_to_ptr.vmem [resolvable:$false] %s1885_s17 }
  0x66   : > { %v843_v27 = vmul.f32 %v2179_v13, %v207_v10  ;;  %v844_v28 = vmul.f32 %v2182_v14, %v208_v12  ;;  %v845_v29 = vmul.f32 %v2186_v16, %v209_v15  ;;  %v846_v30 = vmul.f32 %v2190_v18, %v210_v17  ;;  %v225_v63 = vld [vmem:[%s2150_s4 + $0x90] sm:$0xff]  ;;  %v226_v0 = vld [vmem:[%s2150_s4 + $0x98] sm:$0xff]  ;;  %v227_v1 = vld [vmem:[%s2150_s4 + $0xa0] sm:$0xff]  ;;  %s1887_s30 = scalar_lea.vmem %s1886_s17, 98304  ;;  %p1888_p0 = scmp.lt.s32.totalorder %s3475_s23, %s1886_s17 }
  0x67   : > { %v847_v34 = vmul.f32 %v2194_v20, %v211_v19  ;;  %v848_v35 = vmul.f32 %v2198_v22, %v212_v21  ;;  %v849_v36 = vmul.f32 %v2202_v24, %v213_v23  ;;  %v850_v37 = vmul.f32 %v2206_v26, %v214_v25  ;;  %v228_v17 = vld [vmem:[%s2150_s4 + $0xa8] sm:$0xff]  ;;  %v229_v19 = vld [vmem:[%s2150_s4 + $0xb0] sm:$0xff]  ;;  %v230_v21 = vld [vmem:[%s2150_s4 + $0xb8] sm:$0xff]  ;;  %p1889_p9 = scmp.lt.s32.totalorder %s1887_s30, %s1881_s29 }
  0x68   : > { %1227 = vst [vmem:[%s2223_s18] sm:$0xff] %v843_v27  ;;  %1228 = vst [vmem:[%s2223_s18 + $0x8] sm:$0xff] %v844_v28  ;;  %v2230_v41 = vrot.slane %v592_v32, %v2160_v2  ;;  %v2233_v42 = vrot.slane %v592_v32, %v2162_v3  ;;  %v2236_v43 = vrot.slane %v592_v32, %v2164_v4 }
  0x69   : > { %1229 = vst [vmem:[%s2223_s18 + $0x10] sm:$0xff] %v845_v29  ;;  %1230 = vst [vmem:[%s2223_s18 + $0x18] sm:$0xff] %v846_v30  ;;  %v2239_v44 = vrot.slane %v592_v32, %v2166_v5  ;;  %v2249_v48 = vrot.slane %v592_v32, %v2168_v6  ;;  %v2252_v49 = vrot.slane %v592_v32, %v2170_v7  ;;  %v594_v29 = vld [vmem:[#allocation5 + $0x18] sm:$0xff]  ;;  %p1890_p3 = por %p1889_p9, %p1888_p0 }
  0x6a   : > { %1231 = vst [vmem:[%s2223_s18 + $0x20] sm:$0xff] %v847_v34  ;;  %1232 = vst [vmem:[%s2223_s18 + $0x28] sm:$0xff] %v848_v35  ;;  %v2255_v50 = vrot.slane %v592_v32, %v2172_v8  ;;  %v2258_v51 = vrot.slane %v592_v32, %v2174_v9  ;;  %v851_v53 = vmul.f32 %v2230_v41, %v215_v31  ;;  %v231_v34 = vld [vmem:[%s2150_s4 + $0xc0] sm:$0xff]  ;;  %v232_v35 = vld [vmem:[%s2150_s4 + $0xc8] sm:$0xff] }
  0x6b   : > { %1233 = vst [vmem:[%s2223_s18 + $0x30] sm:$0xff] %v849_v36  ;;  %1234 = vst [vmem:[%s2223_s18 + $0x38] sm:$0xff] %v850_v37  ;;  %v852_v54 = vmul.f32 %v2233_v42, %v216_v33  ;;  %v853_v55 = vmul.f32 %v2236_v43, %v217_v38  ;;  %v854_v56 = vmul.f32 %v2239_v44, %v218_v39  ;;  %p1891_p7 = pnand %p1890_p3, %p1884_p13 }
  0x6c   : > { %v855_v59 = vmul.f32 %v2249_v48, %v219_v40  ;;  %v856_v60 = vmul.f32 %v2252_v49, %v220_v45  ;;  %v857_v61 = vmul.f32 %v2255_v50, %v221_v46  ;;  %v858_v62 = vmul.f32 %v2258_v51, %v222_v47  ;;  %1235 = vst [vmem:[%s2223_s18 + $0x40] sm:$0xff] %v851_v53  ;;  %v233_v40 = vld [vmem:[%s2150_s4 + $0xd0] sm:$0xff]  ;;  %v234_v45 = vld [vmem:[%s2150_s4 + $0xd8] sm:$0xff]  ;;  %v235_v46 = vld [vmem:[%s2150_s4 + $0xe0] sm:$0xff] }
  0x6d   : > { %1236 = vst [vmem:[%s2223_s18 + $0x48] sm:$0xff] %v852_v54  ;;  %1237 = vst [vmem:[%s2223_s18 + $0x50] sm:$0xff] %v853_v55  ;;  %v2278_v10 = vrot.slane %v593_v52, %v2160_v2  ;;  %v2281_v11 = vrot.slane %v593_v52, %v2162_v3  ;;  %v2284_v12 = vrot.slane %v593_v52, %v2164_v4  ;;  %v236_v55 = vld [vmem:[%s2150_s4 + $0xe8] sm:$0xff] }
  0x6e   : > { %1238 = vst [vmem:[%s2223_s18 + $0x58] sm:$0xff] %v854_v56  ;;  %v2287_v15 = vrot.slane %v593_v52, %v2166_v5  ;;  %1239 = vst [vmem:[%s2223_s18 + $0x60] sm:$0xff] %v855_v59  ;;  %v2297_v23 = vrot.slane %v593_v52, %v2168_v6  ;;  %v2300_v25 = vrot.slane %v593_v52, %v2170_v7  ;;  %v237_v56 = vld [vmem:[%s2150_s4 + $0xf0] sm:$0xff] }
  0x6f   : > { %1240 = vst [vmem:[%s2223_s18 + $0x68] sm:$0xff] %v856_v60  ;;  %1241 = vst [vmem:[%s2223_s18 + $0x70] sm:$0xff] %v857_v61  ;;  %v2303_v27 = vrot.slane %v593_v52, %v2172_v8  ;;  %v2306_v28 = vrot.slane %v593_v52, %v2174_v9  ;;  %v859_v30 = vmul.f32 %v2278_v10, %v223_v57  ;;  %v238_v57 = vld [vmem:[%s2150_s4 + $0xf8] sm:$0xff] }
  0x70   : > { %1242 = vst [vmem:[%s2223_s18 + $0x78] sm:$0xff] %v858_v62  ;;  %v860_v31 = vmul.f32 %v2281_v11, %v224_v58  ;;  %v861_v32 = vmul.f32 %v2284_v12, %v225_v63  ;;  %v862_v33 = vmul.f32 %v2287_v15, %v226_v0  ;;  %v863_v36 = vmul.f32 %v2297_v23, %v227_v1  ;;  %v595_v62 = vld [vmem:[#allocation5 + $0x20] sm:$0xff] }
  0x71   : > { %v864_v37 = vmul.f32 %v2300_v25, %v228_v17  ;;  %v865_v38 = vmul.f32 %v2303_v27, %v229_v19  ;;  %v866_v39 = vmul.f32 %v2306_v28, %v230_v21  ;;  %1243 = vst [vmem:[%s2223_s18 + $0x80] sm:$0xff] %v859_v30  ;;  %v2326_v47 = vrot.slane %v594_v29, %v2160_v2  ;;  %v239_v19 = vld [vmem:[%s2150_s4 + $0x100] sm:$0xff]  ;;  %v240_v21 = vld [vmem:[%s2150_s4 + $0x108] sm:$0xff]  ;;  %v241_v30 = vld [vmem:[%s2150_s4 + $0x110] sm:$0xff] }
  0x72   : > { %1244 = vst [vmem:[%s2223_s18 + $0x88] sm:$0xff] %v860_v31  ;;  %1245 = vst [vmem:[%s2223_s18 + $0x90] sm:$0xff] %v861_v32  ;;  %v2329_v52 = vrot.slane %v594_v29, %v2162_v3  ;;  %v2332_v53 = vrot.slane %v594_v29, %v2164_v4  ;;  %v2335_v54 = vrot.slane %v594_v29, %v2166_v5 }
  0x73   : > { %1246 = vst [vmem:[%s2223_s18 + $0x98] sm:$0xff] %v862_v33  ;;  %1247 = vst [vmem:[%s2223_s18 + $0xa0] sm:$0xff] %v863_v36  ;;  %v2345_v58 = vrot.slane %v594_v29, %v2168_v6  ;;  %v2348_v59 = vrot.slane %v594_v29, %v2170_v7  ;;  %v2351_v60 = vrot.slane %v594_v29, %v2172_v8  ;;  %v244_v36 = vld [vmem:[%s2150_s4 + $0x128] sm:$0xff] }
  0x74   : > { %3594 = vst [vmem:[#allocation11_spill] sm:$0xff] %v2329_v52  ;;  %3595 = vst [vmem:[#allocation12_spill] sm:$0xff] %v2332_v53  ;;  %v2354_v61 = vrot.slane %v594_v29, %v2174_v9  ;;  %v867_v63 = vmul.f32 %v2326_v47, %v231_v34  ;;  %v868_v0 = vmul.f32 %v2329_v52, %v232_v35  ;;  %v242_v34 = vld [vmem:[%s2150_s4 + $0x118] sm:$0xff]  ;;  %v243_v35 = vld [vmem:[%s2150_s4 + $0x120] sm:$0xff] }
  0x75   : > { %3596 = vst [vmem:[#allocation13_spill] sm:$0xff] %v2335_v54  ;;  %1248 = vst [vmem:[%s2223_s18 + $0xa8] sm:$0xff] %v864_v37  ;;  %v869_v1 = vmul.f32 %v2332_v53, %v233_v40  ;;  %v870_v17 = vmul.f32 %v2335_v54, %v234_v45  ;;  %v871_v29 = vmul.f32 %v2345_v58, %v235_v46  ;;  %v245_v45 = vld [vmem:[%s2150_s4 + $0x130] sm:$0xff]  ;;  %v246_v46 = vld [vmem:[%s2150_s4 + $0x138] sm:$0xff] }
  0x76   : > { %1249 = vst [vmem:[%s2223_s18 + $0xb0] sm:$0xff] %v865_v38  ;;  %1250 = vst [vmem:[%s2223_s18 + $0xb8] sm:$0xff] %v866_v39  ;;  %v872_v31 = vmul.f32 %v2348_v59, %v236_v55  ;;  %v873_v32 = vmul.f32 %v2351_v60, %v237_v56  ;;  %v874_v33 = vmul.f32 %v2354_v61, %v238_v57  ;;  %v596_v55 = vld [vmem:[#allocation5 + $0x28] sm:$0xff]  ;;  %v254_v54 = vld [vmem:[%s2150_s4 + $0x178] sm:$0xff] }
  0x77   : > { %3597 = vst [vmem:[#allocation14_spill] sm:$0xff] %v2345_v58  ;;  %3598 = vst [vmem:[#allocation15_spill] sm:$0xff] %v2348_v59  ;;  %v2375_v37 = vrot.slane %v595_v62, %v2160_v2  ;;  %v2378_v38 = vrot.slane %v595_v62, %v2162_v3  ;;  %v2381_v39 = vrot.slane %v595_v62, %v2164_v4  ;;  %v252_v59 = vld [vmem:[%s2150_s4 + $0x168] sm:$0xff]  ;;  %v253_v58 = vld [vmem:[%s2150_s4 + $0x170] sm:$0xff] }
  0x78   : > { %3599 = vst [vmem:[#allocation16_spill] sm:$0xff] %v2351_v60  ;;  %3600 = vst [vmem:[#allocation17_spill] sm:$0xff] %v2354_v61  ;;  %v2384_v40 = vrot.slane %v595_v62, %v2166_v5  ;;  %v2393_v56 = vrot.slane %v595_v62, %v2168_v6  ;;  %v2396_v57 = vrot.slane %v595_v62, %v2170_v7  ;;  %v251_v60 = vld [vmem:[%s2150_s4 + $0x160] sm:$0xff] }
  0x79   : > { %1251 = vst [vmem:[%s2223_s18 + $0xc0] sm:$0xff] %v867_v63  ;;  %1252 = vst [vmem:[%s2223_s18 + $0xc8] sm:$0xff] %v868_v0  ;;  %v2399_v63 = vrot.slane %v595_v62, %v2172_v8  ;;  %v2402_v0 = vrot.slane %v595_v62, %v2174_v9  ;;  %v877_v61 = vmul.f32 %v2381_v39, %v241_v30  ;;  %v255_v30 = vld [vmem:[%s2150_s4 + $0x180] sm:$0xff] }
  0x7a   : > { %1253 = vst [vmem:[%s2223_s18 + $0xd0] sm:$0xff] %v869_v1  ;;  %1254 = vst [vmem:[%s2223_s18 + $0xd8] sm:$0xff] %v870_v17  ;;  %v247_v1 = vld [vmem:[%s2150_s4 + $0x140] sm:$0xff]  ;;  %v248_v17 = vld [vmem:[%s2150_s4 + $0x148] sm:$0xff]  ;;  %v878_v62 = vmul.f32 %v2384_v40, %v242_v34  ;;  %v879_v53 = vmul.f32 %v2393_v56, %v243_v35  ;;  %v880_v52 = vmul.f32 %v2396_v57, %v244_v36 }
  0x7b   : > { %3601 = vst [vmem:[#allocation18_spill] sm:$0xff] %v2378_v38  ;;  %3602 = vst [vmem:[#allocation19_spill] sm:$0xff] %v2381_v39  ;;  %v256_v34 = vld [vmem:[%s2150_s4 + $0x188] sm:$0xff]  ;;  %v258_v39 = vld [vmem:[%s2150_s4 + $0x198] sm:$0xff]  ;;  %v2429_v35 = vrot.slane %v596_v55, %v2160_v2  ;;  %v2432_v36 = vrot.slane %v596_v55, %v2162_v3  ;;  %v2449_v2 = vrot.slane %v596_v55, %v2168_v6 }
  0x7c   : > { %3603 = vst [vmem:[#allocation20_spill] sm:$0xff] %v2384_v40  ;;  %1255 = vst [vmem:[%s2223_s18 + $0xe0] sm:$0xff] %v871_v29  ;;  %v249_v29 = vld [vmem:[%s2150_s4 + $0x150] sm:$0xff]  ;;  %v2452_v3 = vrot.slane %v596_v55, %v2170_v7 }
  0x7d   : > { %1256 = vst [vmem:[%s2223_s18 + $0xe8] sm:$0xff] %v872_v31  ;;  %1257 = vst [vmem:[%s2223_s18 + $0xf0] sm:$0xff] %v873_v32  ;;  %v250_v31 = vld [vmem:[%s2150_s4 + $0x158] sm:$0xff]  ;;  %v875_v32 = vmul.f32 %v2375_v37, %v239_v19  ;;  %v881_v19 = vmul.f32 %v2399_v63, %v245_v45  ;;  %v257_v40 = vld [vmem:[%s2150_s4 + $0x190] sm:$0xff]  ;;  %v2435_v45 = vrot.slane %v596_v55, %v2164_v4 }
  0x7e   : > { %1258 = vst [vmem:[%s2223_s18 + $0xf8] sm:$0xff] %v874_v33  ;;  %3604 = vst [vmem:[#allocation21_spill] sm:$0xff] %v2393_v56  ;;  %v876_v33 = vmul.f32 %v2378_v38, %v240_v21  ;;  %v882_v21 = vmul.f32 %v2402_v0, %v246_v46  ;;  %v2438_v46 = vrot.slane %v596_v55, %v2166_v5 }
  0x7f   : > { %3605 = vst [vmem:[#allocation22_spill] sm:$0xff] %v2396_v57  ;;  %3606 = vst [vmem:[#allocation23_spill] sm:$0xff] %v2399_v63  ;;  %v2455_v4 = vrot.slane %v596_v55, %v2172_v8  ;;  %v2458_v5 = vrot.slane %v596_v55, %v2174_v9  ;;  %v883_v6 = vmul.f32 %v2429_v35, %v247_v1  ;;  %v267_v55 = vld [vmem:[%s2150_s4 + $0x1e0] sm:$0xff]  ;;  %v269_v63 = vld [vmem:[%s2150_s4 + $0x1f0] sm:$0xff] }
  0x80   : > { %3607 = vst [vmem:[#allocation24_spill] sm:$0xff] %v2402_v0  ;;  %1259 = vst [vmem:[%s2223_s18 + $0x100] sm:$0xff] %v875_v32  ;;  %v259_v32 = vld [vmem:[%s2150_s4 + $0x1a0] sm:$0xff]  ;;  %v884_v7 = vmul.f32 %v2432_v36, %v248_v17  ;;  %v885_v8 = vmul.f32 %v2435_v45, %v249_v29  ;;  %v886_v9 = vmul.f32 %v2438_v46, %v250_v31  ;;  %v268_v0 = vld [vmem:[%s2150_s4 + $0x1e8] sm:$0xff] }
  0x81   : > { %1260 = vst [vmem:[%s2223_s18 + $0x108] sm:$0xff] %v876_v33  ;;  %1261 = vst [vmem:[%s2223_s18 + $0x110] sm:$0xff] %v877_v61  ;;  %v260_v33 = vld [vmem:[%s2150_s4 + $0x1a8] sm:$0xff]  ;;  %v261_v61 = vld [vmem:[%s2150_s4 + $0x1b0] sm:$0xff]  ;;  %v887_v56 = vmul.f32 %v2449_v2, %v251_v60  ;;  %v888_v38 = vmul.f32 %v2452_v3, %v252_v59  ;;  %v889_v1 = vmul.f32 %v2455_v4, %v253_v58 }
  0x82   : > { %1262 = vst [vmem:[%s2223_s18 + $0x118] sm:$0xff] %v878_v62  ;;  %3608 = vst [vmem:[#allocation25_spill] sm:$0xff] %v2435_v45  ;;  %v262_v62 = vld [vmem:[%s2150_s4 + $0x1b8] sm:$0xff]  ;;  %v890_v17 = vmul.f32 %v2458_v5, %v254_v54  ;;  %v271_v29 = vld [vmem:[%s2150_s4 + $0x200] sm:$0xff]  ;;  %v891_v59 = vmul.f32 %v2179_v13, %v255_v30  ;;  %v892_v58 = vmul.f32 %v2182_v14, %v256_v34 }
  0x83   : > { %3609 = vst [vmem:[#allocation26_spill] sm:$0xff] %v2438_v46  ;;  %1263 = vst [vmem:[%s2223_s18 + $0x120] sm:$0xff] %v879_v53  ;;  %v263_v53 = vld [vmem:[%s2150_s4 + $0x1c0] sm:$0xff]  ;;  %v270_v57 = vld [vmem:[%s2150_s4 + $0x1f8] sm:$0xff]  ;;  %v893_v54 = vmul.f32 %v2186_v16, %v257_v40  ;;  %v894_v60 = vmul.f32 %v2190_v18, %v258_v39  ;;  %v895_v30 = vmul.f32 %v2194_v20, %v259_v32 }
  0x84   : > { %1264 = vst [vmem:[%s2223_s18 + $0x128] sm:$0xff] %v880_v52  ;;  %1265 = vst [vmem:[%s2223_s18 + $0x130] sm:$0xff] %v881_v19  ;;  %v264_v52 = vld [vmem:[%s2150_s4 + $0x1c8] sm:$0xff]  ;;  %v265_v19 = vld [vmem:[%s2150_s4 + $0x1d0] sm:$0xff]  ;;  %v896_v40 = vmul.f32 %v2198_v22, %v260_v33  ;;  %v897_v39 = vmul.f32 %v2202_v24, %v261_v61  ;;  %v898_v34 = vmul.f32 %v2206_v26, %v262_v62 }
  0x85   : > { %1266 = vst [vmem:[%s2223_s18 + $0x138] sm:$0xff] %v882_v21  ;;  %3610 = vst [vmem:[#allocation27_spill] sm:$0xff] %v2455_v4  ;;  %v266_v21 = vld [vmem:[%s2150_s4 + $0x1d8] sm:$0xff]  ;;  %v272_v31 = vld [vmem:[%s2150_s4 + $0x208] sm:$0xff]  ;;  %v900_v32 = vmul.f32 %v2233_v42, %v264_v52  ;;  %v901_v33 = vmul.f32 %v2236_v43, %v265_v19  ;;  %v904_v52 = vmul.f32 %v2252_v49, %v268_v0 }
  0x86   : > { %3611 = vst [vmem:[#allocation28_spill] sm:$0xff] %v2458_v5  ;;  %v273_v46 = vld [vmem:[%s2150_s4 + $0x210] sm:$0xff]  ;;  %v274_v45 = vld [vmem:[%s2150_s4 + $0x218] sm:$0xff]  ;;  %1267 = vst [vmem:[%s2223_s18 + $0x140] sm:$0xff] %v883_v6  ;;  %v902_v61 = vmul.f32 %v2239_v44, %v266_v21  ;;  %v905_v19 = vmul.f32 %v2255_v50, %v269_v63  ;;  %v906_v21 = vmul.f32 %v2258_v51, %v270_v57 }
  0x87   : > { %1268 = vst [vmem:[%s2223_s18 + $0x148] sm:$0xff] %v884_v7  ;;  %1269 = vst [vmem:[%s2223_s18 + $0x150] sm:$0xff] %v885_v8  ;;  %v275_v5 = vld [vmem:[%s2150_s4 + $0x220] sm:$0xff]  ;;  %v276_v4 = vld [vmem:[%s2150_s4 + $0x228] sm:$0xff]  ;;  %v908_v0 = vmul.f32 %v2281_v11, %v272_v31  ;;  %v909_v63 = vmul.f32 %v2284_v12, %v273_v46  ;;  %v910_v57 = vmul.f32 %v2287_v15, %v274_v45 }
  0x88   : > { %1270 = vst [vmem:[%s2223_s18 + $0x158] sm:$0xff] %v886_v9  ;;  %v277_v6 = vld [vmem:[%s2150_s4 + $0x230] sm:$0xff]  ;;  %v278_v7 = vld [vmem:[%s2150_s4 + $0x238] sm:$0xff]  ;;  %1271 = vst [vmem:[%s2223_s18 + $0x160] sm:$0xff] %v887_v56  ;;  %v899_v56 = vmul.f32 %v2230_v41, %v263_v53  ;;  %v903_v53 = vmul.f32 %v2249_v48, %v267_v55  ;;  %v907_v55 = vmul.f32 %v2278_v10, %v271_v29 }
  0x89   : > { %1272 = vst [vmem:[%s2223_s18 + $0x168] sm:$0xff] %v888_v38  ;;  %1273 = vst [vmem:[%s2223_s18 + $0x170] sm:$0xff] %v889_v1  ;;  %v279_v8 = vld [vmem:[%s2150_s4 + $0x240] sm:$0xff]  ;;  %v280_v9 = vld [vmem:[%s2150_s4 + $0x248] sm:$0xff]  ;;  %v911_v29 = vmul.f32 %v2297_v23, %v275_v5  ;;  %v912_v31 = vmul.f32 %v2300_v25, %v276_v4  ;;  %v913_v46 = vmul.f32 %v2303_v27, %v277_v6 }
  0x8a   : > { %1274 = vst [vmem:[%s2223_s18 + $0x178] sm:$0xff] %v890_v17  ;;  %v281_v38 = vld [vmem:[%s2150_s4 + $0x250] sm:$0xff]  ;;  %1275 = vst [vmem:[%s2223_s18 + $0x180] sm:$0xff] %v891_v59  ;;  %v282_v62 = vld [vmem:[%s2150_s4 + $0x258] sm:$0xff]  ;;  %v914_v45 = vmul.f32 %v2306_v28, %v278_v7  ;;  %v915_v5 = vmul.f32 %v2326_v47, %v279_v8 }
  0x8b   : > { %1276 = vst [vmem:[%s2223_s18 + $0x188] sm:$0xff] %v892_v58  ;;  %1277 = vst [vmem:[%s2223_s18 + $0x190] sm:$0xff] %v893_v54  ;;  %v283_v1 = vld [vmem:[%s2150_s4 + $0x260] sm:$0xff]  ;;  %v284_v17 = vld [vmem:[%s2150_s4 + $0x268] sm:$0xff] }
  0x8c   : > { %1278 = vst [vmem:[%s2223_s18 + $0x198] sm:$0xff] %v894_v60  ;;  %1279 = vst [vmem:[%s2223_s18 + $0x1a0] sm:$0xff] %v895_v30  ;;  %v285_v59 = vld [vmem:[%s2150_s4 + $0x270] sm:$0xff]  ;;  %v286_v58 = vld [vmem:[%s2150_s4 + $0x278] sm:$0xff] }
  0x8d   : > { %1280 = vst [vmem:[%s2223_s18 + $0x1a8] sm:$0xff] %v896_v40  ;;  %1281 = vst [vmem:[%s2223_s18 + $0x1b0] sm:$0xff] %v897_v39  ;;  %v287_v54 = vld [vmem:[%s2150_s4 + $0x280] sm:$0xff]  ;;  %v288_v60 = vld [vmem:[%s2150_s4 + $0x288] sm:$0xff] }
  0x8e   : > { %1282 = vst [vmem:[%s2223_s18 + $0x1b8] sm:$0xff] %v898_v34  ;;  %1283 = vst [vmem:[%s2223_s18 + $0x1c0] sm:$0xff] %v899_v56  ;;  %v289_v30 = vld [vmem:[%s2150_s4 + $0x290] sm:$0xff]  ;;  %v290_v40 = vld [vmem:[%s2150_s4 + $0x298] sm:$0xff] }
  0x8f   : > { %1284 = vst [vmem:[%s2223_s18 + $0x1c8] sm:$0xff] %v900_v32  ;;  %1285 = vst [vmem:[%s2223_s18 + $0x1d0] sm:$0xff] %v901_v33  ;;  %v291_v39 = vld [vmem:[%s2150_s4 + $0x2a0] sm:$0xff]  ;;  %v292_v34 = vld [vmem:[%s2150_s4 + $0x2a8] sm:$0xff] }
  0x90   : > { %1286 = vst [vmem:[%s2223_s18 + $0x1d8] sm:$0xff] %v902_v61  ;;  %1287 = vst [vmem:[%s2223_s18 + $0x1e0] sm:$0xff] %v903_v53  ;;  %v293_v56 = vld [vmem:[%s2150_s4 + $0x2b0] sm:$0xff]  ;;  %v3613_v6 = vld [vmem:[#allocation12_spill] sm:$0xff] }
  0x91   : > { %1288 = vst [vmem:[%s2223_s18 + $0x1e8] sm:$0xff] %v904_v52  ;;  %1289 = vst [vmem:[%s2223_s18 + $0x1f0] sm:$0xff] %v905_v19  ;;  %v3612_v4 = vld [vmem:[#allocation11_spill] sm:$0xff]  ;;  %v917_v33 = vmul.f32 %v3613_v6, %v281_v38  ;;  %v3614_v7 = vld [vmem:[#allocation13_spill] sm:$0xff] }
  0x92   : > { %1290 = vst [vmem:[%s2223_s18 + $0x1f8] sm:$0xff] %v906_v21  ;;  %1291 = vst [vmem:[%s2223_s18 + $0x200] sm:$0xff] %v907_v55  ;;  %v916_v32 = vmul.f32 %v3612_v4, %v280_v9  ;;  %v918_v61 = vmul.f32 %v3614_v7, %v282_v62  ;;  %v294_v53 = vld [vmem:[%s2150_s4 + $0x2b8] sm:$0xff]  ;;  %v295_v52 = vld [vmem:[%s2150_s4 + $0x2c0] sm:$0xff] }
  0x93   : > { %1292 = vst [vmem:[%s2223_s18 + $0x208] sm:$0xff] %v908_v0  ;;  %1293 = vst [vmem:[%s2223_s18 + $0x210] sm:$0xff] %v909_v63  ;;  %v296_v19 = vld [vmem:[%s2150_s4 + $0x2c8] sm:$0xff]  ;;  %v3616_v9 = vld [vmem:[#allocation15_spill] sm:$0xff] }
  0x94   : > { %1294 = vst [vmem:[%s2223_s18 + $0x218] sm:$0xff] %v910_v57  ;;  %1295 = vst [vmem:[%s2223_s18 + $0x220] sm:$0xff] %v911_v29  ;;  %v3615_v8 = vld [vmem:[#allocation14_spill] sm:$0xff]  ;;  %v920_v55 = vmul.f32 %v3616_v9, %v284_v17  ;;  %v3617_v38 = vld [vmem:[#allocation16_spill] sm:$0xff] }
  0x95   : > { %1296 = vst [vmem:[%s2223_s18 + $0x228] sm:$0xff] %v912_v31  ;;  %1297 = vst [vmem:[%s2223_s18 + $0x230] sm:$0xff] %v913_v46  ;;  %v919_v21 = vmul.f32 %v3615_v8, %v283_v1  ;;  %v921_v0 = vmul.f32 %v3617_v38, %v285_v59  ;;  %v3618_v62 = vld [vmem:[#allocation17_spill] sm:$0xff]  ;;  %v297_v57 = vld [vmem:[%s2150_s4 + $0x2d0] sm:$0xff]  ;;  %v923_v1 = vmul.f32 %v2375_v37, %v287_v54 }
  0x96   : > { %1298 = vst [vmem:[%s2223_s18 + $0x238] sm:$0xff] %v914_v45  ;;  %v922_v63 = vmul.f32 %v3618_v62, %v286_v58  ;;  %v298_v7 = vld [vmem:[%s2150_s4 + $0x2d8] sm:$0xff]  ;;  %v299_v29 = vld [vmem:[%s2150_s4 + $0x2e0] sm:$0xff]  ;;  %1299 = vst [vmem:[%s2223_s18 + $0x240] sm:$0xff] %v915_v5 }
  0x97   : > { %1300 = vst [vmem:[%s2223_s18 + $0x248] sm:$0xff] %v916_v32  ;;  %1301 = vst [vmem:[%s2223_s18 + $0x250] sm:$0xff] %v917_v33  ;;  %v3619_v17 = vld [vmem:[#allocation18_spill] sm:$0xff]  ;;  %v3620_v59 = vld [vmem:[#allocation19_spill] sm:$0xff] }
  0x98   : > { %1302 = vst [vmem:[%s2223_s18 + $0x258] sm:$0xff] %v918_v61  ;;  %v924_v31 = vmul.f32 %v3619_v17, %v288_v60  ;;  %v925_v46 = vmul.f32 %v3620_v59, %v289_v30  ;;  %v3621_v58 = vld [vmem:[#allocation20_spill] sm:$0xff]  ;;  %v300_v62 = vld [vmem:[%s2150_s4 + $0x2e8] sm:$0xff]  ;;  %v301_v38 = vld [vmem:[%s2150_s4 + $0x2f0] sm:$0xff] }
  0x99   : > { %v926_v45 = vmul.f32 %v3621_v58, %v290_v40  ;;  %v302_v5 = vld [vmem:[%s2150_s4 + $0x2f8] sm:$0xff]  ;;  %1303 = vst [vmem:[%s2223_s18 + $0x260] sm:$0xff] %v919_v21  ;;  %1304 = vst [vmem:[%s2223_s18 + $0x268] sm:$0xff] %v920_v55  ;;  %v3622_v54 = vld [vmem:[#allocation21_spill] sm:$0xff] }
  0x9a   : > { %1305 = vst [vmem:[%s2223_s18 + $0x270] sm:$0xff] %v921_v0  ;;  %1306 = vst [vmem:[%s2223_s18 + $0x278] sm:$0xff] %v922_v63  ;;  %v927_v32 = vmul.f32 %v3622_v54, %v291_v39  ;;  %v3623_v60 = vld [vmem:[#allocation22_spill] sm:$0xff]  ;;  %v3624_v30 = vld [vmem:[#allocation23_spill] sm:$0xff]  ;;  %v931_v39 = vmul.f32 %v2429_v35, %v295_v52  ;;  %v935_v52 = vmul.f32 %v2449_v2, %v299_v29 }
  0x9b   : > { %v928_v33 = vmul.f32 %v3623_v60, %v292_v34  ;;  %v929_v61 = vmul.f32 %v3624_v30, %v293_v56  ;;  %v3625_v40 = vld [vmem:[#allocation24_spill] sm:$0xff]  ;;  %v303_v59 = vld [vmem:[%s2150_s4 + $0x300] sm:$0xff]  ;;  %v304_v17 = vld [vmem:[%s2150_s4 + $0x308] sm:$0xff]  ;;  %1307 = vst [vmem:[%s2223_s18 + $0x280] sm:$0xff] %v923_v1  ;;  %v932_v34 = vmul.f32 %v2432_v36, %v296_v19  ;;  %v936_v19 = vmul.f32 %v2452_v3, %v300_v62 }
  0x9c   : > { %v930_v58 = vmul.f32 %v3625_v40, %v294_v53  ;;  %v305_v21 = vld [vmem:[%s2150_s4 + $0x310] sm:$0xff]  ;;  %1308 = vst [vmem:[%s2223_s18 + $0x288] sm:$0xff] %v924_v31  ;;  %1309 = vst [vmem:[%s2223_s18 + $0x290] sm:$0xff] %v925_v46  ;;  %v3626_v56 = vld [vmem:[#allocation25_spill] sm:$0xff]  ;;  %v939_v29 = vmul.f32 %v2179_v13, %v303_v59  ;;  %v940_v62 = vmul.f32 %v2182_v14, %v304_v17 }
  0x9d   : > { %1310 = vst [vmem:[%s2223_s18 + $0x298] sm:$0xff] %v926_v45  ;;  %v933_v55 = vmul.f32 %v3626_v56, %v297_v57  ;;  %v3627_v53 = vld [vmem:[#allocation26_spill] sm:$0xff]  ;;  %v306_v63 = vld [vmem:[%s2150_s4 + $0x318] sm:$0xff]  ;;  %v307_v40 = vld [vmem:[%s2150_s4 + $0x320] sm:$0xff] }
  0x9e   : > { %v934_v0 = vmul.f32 %v3627_v53, %v298_v7  ;;  %v308_v1 = vld [vmem:[%s2150_s4 + $0x328] sm:$0xff]  ;;  %1311 = vst [vmem:[%s2223_s18 + $0x2a0] sm:$0xff] %v927_v32  ;;  %1312 = vst [vmem:[%s2223_s18 + $0x2a8] sm:$0xff] %v928_v33  ;;  %v3628_v57 = vld [vmem:[#allocation27_spill] sm:$0xff]  ;;  %v943_v59 = vmul.f32 %v2194_v20, %v307_v40 }
  0x9f   : > { %1313 = vst [vmem:[%s2223_s18 + $0x2b0] sm:$0xff] %v929_v61  ;;  %1314 = vst [vmem:[%s2223_s18 + $0x2b8] sm:$0xff] %v930_v58  ;;  %v937_v31 = vmul.f32 %v3628_v57, %v301_v38  ;;  %v3629_v7 = vld [vmem:[#allocation28_spill] sm:$0xff]  ;;  %v309_v45 = vld [vmem:[%s2150_s4 + $0x330] sm:$0xff]  ;;  %v941_v38 = vmul.f32 %v2186_v16, %v305_v21  ;;  %v942_v58 = vmul.f32 %v2190_v18, %v306_v63 }
  0xa0   : > { %v938_v46 = vmul.f32 %v3629_v7, %v302_v5  ;;  %v310_v53 = vld [vmem:[%s2150_s4 + $0x338] sm:$0xff]  ;;  %v311_v32 = vld [vmem:[%s2150_s4 + $0x340] sm:$0xff]  ;;  %1315 = vst [vmem:[%s2223_s18 + $0x2c0] sm:$0xff] %v931_v39  ;;  %1316 = vst [vmem:[%s2223_s18 + $0x2c8] sm:$0xff] %v932_v34  ;;  %v944_v17 = vmul.f32 %v2198_v22, %v308_v1  ;;  %v945_v21 = vmul.f32 %v2202_v24, %v309_v45 }
  0xa1   : > { %1317 = vst [vmem:[%s2223_s18 + $0x2d0] sm:$0xff] %v933_v55  ;;  %1318 = vst [vmem:[%s2223_s18 + $0x2d8] sm:$0xff] %v934_v0  ;;  %v312_v5 = vld [vmem:[%s2150_s4 + $0x348] sm:$0xff]  ;;  %v313_v33 = vld [vmem:[%s2150_s4 + $0x350] sm:$0xff]  ;;  %v946_v39 = vmul.f32 %v2206_v26, %v310_v53  ;;  %v947_v40 = vmul.f32 %v2230_v41, %v311_v32 }
  0xa2   : > { %v314_v61 = vld [vmem:[%s2150_s4 + $0x358] sm:$0xff]  ;;  %1319 = vst [vmem:[%s2223_s18 + $0x2e0] sm:$0xff] %v935_v52  ;;  %1320 = vst [vmem:[%s2223_s18 + $0x2e8] sm:$0xff] %v936_v19  ;;  %v315_v34 = vld [vmem:[%s2150_s4 + $0x360] sm:$0xff]  ;;  %v948_v63 = vmul.f32 %v2233_v42, %v312_v5  ;;  %v949_v1 = vmul.f32 %v2236_v43, %v313_v33 }
  0xa3   : > { %1321 = vst [vmem:[%s2223_s18 + $0x2f0] sm:$0xff] %v937_v31  ;;  %1322 = vst [vmem:[%s2223_s18 + $0x2f8] sm:$0xff] %v938_v46  ;;  %v316_v55 = vld [vmem:[%s2150_s4 + $0x368] sm:$0xff]  ;;  %v317_v0 = vld [vmem:[%s2150_s4 + $0x370] sm:$0xff]  ;;  %v950_v53 = vmul.f32 %v2239_v44, %v314_v61  ;;  %v951_v46 = vmul.f32 %v2249_v48, %v315_v34 }
  0xa4   : > { %1323 = vst [vmem:[%s2223_s18 + $0x300] sm:$0xff] %v939_v29  ;;  %1324 = vst [vmem:[%s2223_s18 + $0x308] sm:$0xff] %v940_v62  ;;  %v318_v52 = vld [vmem:[%s2150_s4 + $0x378] sm:$0xff]  ;;  %v319_v19 = vld [vmem:[%s2150_s4 + $0x380] sm:$0xff]  ;;  %v952_v45 = vmul.f32 %v2252_v49, %v316_v55  ;;  %v953_v32 = vmul.f32 %v2255_v50, %v317_v0 }
  0xa5   : > { %1325 = vst [vmem:[%s2223_s18 + $0x310] sm:$0xff] %v941_v38  ;;  %1326 = vst [vmem:[%s2223_s18 + $0x318] sm:$0xff] %v942_v58  ;;  %v320_v31 = vld [vmem:[%s2150_s4 + $0x388] sm:$0xff]  ;;  %v954_v29 = vmul.f32 %v2258_v51, %v318_v52  ;;  %v321_v62 = vld [vmem:[%s2150_s4 + $0x390] sm:$0xff]  ;;  %v955_v5 = vmul.f32 %v2278_v10, %v319_v19 }
  0xa6   : > { %1327 = vst [vmem:[%s2223_s18 + $0x320] sm:$0xff] %v943_v59  ;;  %1328 = vst [vmem:[%s2223_s18 + $0x328] sm:$0xff] %v944_v17  ;;  %v322_v38 = vld [vmem:[%s2150_s4 + $0x398] sm:$0xff]  ;;  %v323_v58 = vld [vmem:[%s2150_s4 + $0x3a0] sm:$0xff]  ;;  %v956_v33 = vmul.f32 %v2281_v11, %v320_v31  ;;  %v957_v61 = vmul.f32 %v2284_v12, %v321_v62 }
  0xa7   : > { %1329 = vst [vmem:[%s2223_s18 + $0x330] sm:$0xff] %v945_v21  ;;  %1330 = vst [vmem:[%s2223_s18 + $0x338] sm:$0xff] %v946_v39  ;;  %v958_v59 = vmul.f32 %v2287_v15, %v322_v38  ;;  %v324_v17 = vld [vmem:[%s2150_s4 + $0x3a8] sm:$0xff]  ;;  %v325_v21 = vld [vmem:[%s2150_s4 + $0x3b0] sm:$0xff]  ;;  %v959_v34 = vmul.f32 %v2297_v23, %v323_v58 }
  0xa8   : > { %1331 = vst [vmem:[%s2223_s18 + $0x340] sm:$0xff] %v947_v40  ;;  %1332 = vst [vmem:[%s2223_s18 + $0x348] sm:$0xff] %v948_v63  ;;  %v326_v39 = vld [vmem:[%s2150_s4 + $0x3b8] sm:$0xff]  ;;  %v960_v55 = vmul.f32 %v2300_v25, %v324_v17  ;;  %v961_v0 = vmul.f32 %v2303_v27, %v325_v21  ;;  %v327_v63 = vld [vmem:[%s2150_s4 + $0x3c0] sm:$0xff] }
  0xa9   : > { %1333 = vst [vmem:[%s2223_s18 + $0x350] sm:$0xff] %v949_v1  ;;  %1334 = vst [vmem:[%s2223_s18 + $0x358] sm:$0xff] %v950_v53  ;;  %v962_v40 = vmul.f32 %v2306_v28, %v326_v39  ;;  %v328_v1 = vld [vmem:[%s2150_s4 + $0x3c8] sm:$0xff]  ;;  %v329_v53 = vld [vmem:[%s2150_s4 + $0x3d0] sm:$0xff]  ;;  %v963_v52 = vmul.f32 %v2326_v47, %v327_v63 }
  0xaa   : > { %1335 = vst [vmem:[%s2223_s18 + $0x360] sm:$0xff] %v951_v46  ;;  %1336 = vst [vmem:[%s2223_s18 + $0x368] sm:$0xff] %v952_v45  ;;  %v964_v19 = vmul.f32 %v3612_v4, %v328_v1  ;;  %v965_v31 = vmul.f32 %v3613_v6, %v329_v53  ;;  %v330_v46 = vld [vmem:[%s2150_s4 + $0x3d8] sm:$0xff]  ;;  %v331_v45 = vld [vmem:[%s2150_s4 + $0x3e0] sm:$0xff] }
  0xab   : > { %1337 = vst [vmem:[%s2223_s18 + $0x370] sm:$0xff] %v953_v32  ;;  %1338 = vst [vmem:[%s2223_s18 + $0x378] sm:$0xff] %v954_v29  ;;  %v332_v32 = vld [vmem:[%s2150_s4 + $0x3e8] sm:$0xff]  ;;  %v3630_v29 = vld [vmem:[#allocation13_spill] sm:$0xff]  ;;  %v967_v38 = vmul.f32 %v3615_v8, %v331_v45 }
  0xac   : > { %1339 = vst [vmem:[%s2223_s18 + $0x380] sm:$0xff] %v955_v5  ;;  %1340 = vst [vmem:[%s2223_s18 + $0x388] sm:$0xff] %v956_v33  ;;  %v966_v62 = vmul.f32 %v3630_v29, %v330_v46  ;;  %v968_v58 = vmul.f32 %v3616_v9, %v332_v32  ;;  %v333_v5 = vld [vmem:[%s2150_s4 + $0x3f0] sm:$0xff]  ;;  %v334_v33 = vld [vmem:[%s2150_s4 + $0x3f8] sm:$0xff] }
  0xad   : > { %1341 = vst [vmem:[%s2223_s18 + $0x390] sm:$0xff] %v957_v61  ;;  %1342 = vst [vmem:[%s2223_s18 + $0x398] sm:$0xff] %v958_v59  ;;  %v335_v61 = vld [vmem:[%s2150_s4 + $0x400] sm:$0xff]  ;;  %v3631_v59 = vld [vmem:[#allocation16_spill] sm:$0xff] }
  0xae   : > { %1343 = vst [vmem:[%s2223_s18 + $0x3a0] sm:$0xff] %v959_v34  ;;  %1344 = vst [vmem:[%s2223_s18 + $0x3a8] sm:$0xff] %v960_v55  ;;  %v969_v17 = vmul.f32 %v3631_v59, %v333_v5  ;;  %v3632_v21 = vld [vmem:[#allocation17_spill] sm:$0xff]  ;;  %v971_v34 = vmul.f32 %v2375_v37, %v335_v61  ;;  %v336_v55 = vld [vmem:[%s2150_s4 + $0x408] sm:$0xff] }
  0xaf   : > { %1345 = vst [vmem:[%s2223_s18 + $0x3b0] sm:$0xff] %v961_v0  ;;  %1346 = vst [vmem:[%s2223_s18 + $0x3b8] sm:$0xff] %v962_v40  ;;  %v970_v39 = vmul.f32 %v3632_v21, %v334_v33  ;;  %v337_v0 = vld [vmem:[%s2150_s4 + $0x410] sm:$0xff]  ;;  %v338_v40 = vld [vmem:[%s2150_s4 + $0x418] sm:$0xff] }
  0xb0   : > { %1347 = vst [vmem:[%s2223_s18 + $0x3c0] sm:$0xff] %v963_v52  ;;  %1348 = vst [vmem:[%s2223_s18 + $0x3c8] sm:$0xff] %v964_v19  ;;  %v3633_v63 = vld [vmem:[#allocation18_spill] sm:$0xff]  ;;  %v3634_v53 = vld [vmem:[#allocation19_spill] sm:$0xff] }
  0xb1   : > { %1349 = vst [vmem:[%s2223_s18 + $0x3d0] sm:$0xff] %v965_v31  ;;  %1350 = vst [vmem:[%s2223_s18 + $0x3d8] sm:$0xff] %v966_v62  ;;  %v972_v1 = vmul.f32 %v3633_v63, %v336_v55  ;;  %v973_v52 = vmul.f32 %v3634_v53, %v337_v0  ;;  %v3635_v19 = vld [vmem:[#allocation20_spill] sm:$0xff]  ;;  %v339_v46 = vld [vmem:[%s2150_s4 + $0x420] sm:$0xff] }
  0xb2   : > { %1351 = vst [vmem:[%s2223_s18 + $0x3e0] sm:$0xff] %v967_v38  ;;  %1352 = vst [vmem:[%s2223_s18 + $0x3e8] sm:$0xff] %v968_v58  ;;  %v974_v31 = vmul.f32 %v3635_v19, %v338_v40  ;;  %v340_v45 = vld [vmem:[%s2150_s4 + $0x428] sm:$0xff]  ;;  %v341_v32 = vld [vmem:[%s2150_s4 + $0x430] sm:$0xff]  ;;  %v975_v62 = vmul.f32 %v3622_v54, %v339_v46 }
  0xb3   : > { %1353 = vst [vmem:[%s2223_s18 + $0x3f0] sm:$0xff] %v969_v17  ;;  %1354 = vst [vmem:[%s2223_s18 + $0x3f8] sm:$0xff] %v970_v39  ;;  %v976_v38 = vmul.f32 %v3623_v60, %v340_v45  ;;  %v977_v58 = vmul.f32 %v3624_v30, %v341_v32  ;;  %v342_v5 = vld [vmem:[%s2150_s4 + $0x438] sm:$0xff]  ;;  %v343_v33 = vld [vmem:[%s2150_s4 + $0x440] sm:$0xff] }
  0xb4   : > { %1355 = vst [vmem:[%s2223_s18 + $0x400] sm:$0xff] %v971_v34  ;;  %v344_v61 = vld [vmem:[%s2150_s4 + $0x448] sm:$0xff]  ;;  %1356 = vst [vmem:[%s2223_s18 + $0x408] sm:$0xff] %v972_v1  ;;  %v3636_v17 = vld [vmem:[#allocation24_spill] sm:$0xff]  ;;  %v979_v34 = vmul.f32 %v2429_v35, %v343_v33 }
  0xb5   : > { %1357 = vst [vmem:[%s2223_s18 + $0x410] sm:$0xff] %v973_v52  ;;  %1358 = vst [vmem:[%s2223_s18 + $0x418] sm:$0xff] %v974_v31  ;;  %v978_v39 = vmul.f32 %v3636_v17, %v342_v5  ;;  %v980_v55 = vmul.f32 %v2432_v36, %v344_v61  ;;  %v345_v0 = vld [vmem:[%s2150_s4 + $0x450] sm:$0xff]  ;;  %v346_v40 = vld [vmem:[%s2150_s4 + $0x458] sm:$0xff] }
  0xb6   : > { %v347_v46 = vld [vmem:[%s2150_s4 + $0x460] sm:$0xff]  ;;  %1359 = vst [vmem:[%s2223_s18 + $0x420] sm:$0xff] %v975_v62  ;;  %1360 = vst [vmem:[%s2223_s18 + $0x428] sm:$0xff] %v976_v38  ;;  %v981_v1 = vmul.f32 %v3626_v56, %v345_v0  ;;  %v3637_v52 = vld [vmem:[#allocation26_spill] sm:$0xff] }
  0xb7   : > { %1361 = vst [vmem:[%s2223_s18 + $0x430] sm:$0xff] %v977_v58  ;;  %v982_v31 = vmul.f32 %v3637_v52, %v346_v40  ;;  %v983_v45 = vmul.f32 %v2449_v2, %v347_v46  ;;  %v348_v32 = vld [vmem:[%s2150_s4 + $0x468] sm:$0xff]  ;;  %v349_v5 = vld [vmem:[%s2150_s4 + $0x470] sm:$0xff]  ;;  %v350_v33 = vld [vmem:[%s2150_s4 + $0x478] sm:$0xff] }
  0xb8   : > { %1362 = vst [vmem:[%s2223_s18 + $0x438] sm:$0xff] %v978_v39  ;;  %1363 = vst [vmem:[%s2223_s18 + $0x440] sm:$0xff] %v979_v34  ;;  %v984_v62 = vmul.f32 %v2452_v3, %v348_v32  ;;  %v985_v38 = vmul.f32 %v3628_v57, %v349_v5  ;;  %v986_v58 = vmul.f32 %v3629_v7, %v350_v33  ;;  %v351_v61 = vld [vmem:[%s2150_s4 + $0x480] sm:$0xff]  ;;  %v352_v0 = vld [vmem:[%s2150_s4 + $0x488] sm:$0xff] }
  0xb9   : > { %1364 = vst [vmem:[%s2223_s18 + $0x448] sm:$0xff] %v980_v55  ;;  %v353_v40 = vld [vmem:[%s2150_s4 + $0x490] sm:$0xff]  ;;  %1365 = vst [vmem:[%s2223_s18 + $0x450] sm:$0xff] %v981_v1  ;;  %v987_v39 = vmul.f32 %v2179_v13, %v351_v61  ;;  %v988_v34 = vmul.f32 %v2182_v14, %v352_v0  ;;  %v354_v46 = vld [vmem:[%s2150_s4 + $0x498] sm:$0xff] }
  0xba   : > { %1366 = vst [vmem:[%s2223_s18 + $0x458] sm:$0xff] %v982_v31  ;;  %1367 = vst [vmem:[%s2223_s18 + $0x460] sm:$0xff] %v983_v45  ;;  %v989_v55 = vmul.f32 %v2186_v16, %v353_v40  ;;  %v355_v32 = vld [vmem:[%s2150_s4 + $0x4a0] sm:$0xff]  ;;  %v356_v5 = vld [vmem:[%s2150_s4 + $0x4a8] sm:$0xff]  ;;  %v990_v1 = vmul.f32 %v2190_v18, %v354_v46 }
  0xbb   : > { %1368 = vst [vmem:[%s2223_s18 + $0x468] sm:$0xff] %v984_v62  ;;  %1369 = vst [vmem:[%s2223_s18 + $0x470] sm:$0xff] %v985_v38  ;;  %v991_v31 = vmul.f32 %v2194_v20, %v355_v32  ;;  %v992_v45 = vmul.f32 %v2198_v22, %v356_v5  ;;  %v357_v33 = vld [vmem:[%s2150_s4 + $0x4b0] sm:$0xff]  ;;  %v358_v61 = vld [vmem:[%s2150_s4 + $0x4b8] sm:$0xff] }
  0xbc   : > { %1370 = vst [vmem:[%s2223_s18 + $0x478] sm:$0xff] %v986_v58  ;;  %v359_v0 = vld [vmem:[%s2150_s4 + $0x4c0] sm:$0xff]  ;;  %1371 = vst [vmem:[%s2223_s18 + $0x480] sm:$0xff] %v987_v39  ;;  %v993_v62 = vmul.f32 %v2202_v24, %v357_v33  ;;  %v994_v38 = vmul.f32 %v2206_v26, %v358_v61  ;;  %v360_v40 = vld [vmem:[%s2150_s4 + $0x4c8] sm:$0xff] }
  0xbd   : > { %1372 = vst [vmem:[%s2223_s18 + $0x488] sm:$0xff] %v988_v34  ;;  %1373 = vst [vmem:[%s2223_s18 + $0x490] sm:$0xff] %v989_v55  ;;  %v995_v58 = vmul.f32 %v2230_v41, %v359_v0  ;;  %v361_v46 = vld [vmem:[%s2150_s4 + $0x4d0] sm:$0xff]  ;;  %v362_v32 = vld [vmem:[%s2150_s4 + $0x4d8] sm:$0xff]  ;;  %v996_v39 = vmul.f32 %v2233_v42, %v360_v40 }
  0xbe   : > { %1374 = vst [vmem:[%s2223_s18 + $0x498] sm:$0xff] %v990_v1  ;;  %1375 = vst [vmem:[%s2223_s18 + $0x4a0] sm:$0xff] %v991_v31  ;;  %v997_v34 = vmul.f32 %v2236_v43, %v361_v46  ;;  %v998_v55 = vmul.f32 %v2239_v44, %v362_v32  ;;  %v363_v5 = vld [vmem:[%s2150_s4 + $0x4e0] sm:$0xff]  ;;  %v364_v33 = vld [vmem:[%s2150_s4 + $0x4e8] sm:$0xff] }
  0xbf   : > { %1376 = vst [vmem:[%s2223_s18 + $0x4a8] sm:$0xff] %v992_v45  ;;  %v365_v61 = vld [vmem:[%s2150_s4 + $0x4f0] sm:$0xff]  ;;  %1377 = vst [vmem:[%s2223_s18 + $0x4b0] sm:$0xff] %v993_v62  ;;  %v999_v1 = vmul.f32 %v2249_v48, %v363_v5  ;;  %v1000_v31 = vmul.f32 %v2252_v49, %v364_v33  ;;  %v366_v0 = vld [vmem:[%s2150_s4 + $0x4f8] sm:$0xff] }
  0xc0   : > { %1378 = vst [vmem:[%s2223_s18 + $0x4b8] sm:$0xff] %v994_v38  ;;  %1379 = vst [vmem:[%s2223_s18 + $0x4c0] sm:$0xff] %v995_v58  ;;  %v1001_v45 = vmul.f32 %v2255_v50, %v365_v61  ;;  %v367_v40 = vld [vmem:[%s2150_s4 + $0x500] sm:$0xff]  ;;  %v368_v46 = vld [vmem:[%s2150_s4 + $0x508] sm:$0xff]  ;;  %v1002_v62 = vmul.f32 %v2258_v51, %v366_v0 }
  0xc1   : > { %1380 = vst [vmem:[%s2223_s18 + $0x4c8] sm:$0xff] %v996_v39  ;;  %1381 = vst [vmem:[%s2223_s18 + $0x4d0] sm:$0xff] %v997_v34  ;;  %v1003_v38 = vmul.f32 %v2278_v10, %v367_v40  ;;  %v1004_v58 = vmul.f32 %v2281_v11, %v368_v46  ;;  %v369_v32 = vld [vmem:[%s2150_s4 + $0x510] sm:$0xff]  ;;  %v370_v5 = vld [vmem:[%s2150_s4 + $0x518] sm:$0xff] }
  0xc2   : > { %1382 = vst [vmem:[%s2223_s18 + $0x4d8] sm:$0xff] %v998_v55  ;;  %v371_v33 = vld [vmem:[%s2150_s4 + $0x520] sm:$0xff]  ;;  %1383 = vst [vmem:[%s2223_s18 + $0x4e0] sm:$0xff] %v999_v1  ;;  %v1005_v39 = vmul.f32 %v2284_v12, %v369_v32  ;;  %v1006_v34 = vmul.f32 %v2287_v15, %v370_v5  ;;  %v372_v61 = vld [vmem:[%s2150_s4 + $0x528] sm:$0xff] }
  0xc3   : > { %1384 = vst [vmem:[%s2223_s18 + $0x4e8] sm:$0xff] %v1000_v31  ;;  %1385 = vst [vmem:[%s2223_s18 + $0x4f0] sm:$0xff] %v1001_v45  ;;  %v1007_v55 = vmul.f32 %v2297_v23, %v371_v33  ;;  %v373_v0 = vld [vmem:[%s2150_s4 + $0x530] sm:$0xff]  ;;  %v374_v40 = vld [vmem:[%s2150_s4 + $0x538] sm:$0xff]  ;;  %v1008_v1 = vmul.f32 %v2300_v25, %v372_v61 }
  0xc4   : > { %1386 = vst [vmem:[%s2223_s18 + $0x4f8] sm:$0xff] %v1002_v62  ;;  %1387 = vst [vmem:[%s2223_s18 + $0x500] sm:$0xff] %v1003_v38  ;;  %v1009_v31 = vmul.f32 %v2303_v27, %v373_v0  ;;  %v1010_v45 = vmul.f32 %v2306_v28, %v374_v40  ;;  %v375_v46 = vld [vmem:[%s2150_s4 + $0x540] sm:$0xff]  ;;  %v376_v32 = vld [vmem:[%s2150_s4 + $0x548] sm:$0xff] }
  0xc5   : > { %1388 = vst [vmem:[%s2223_s18 + $0x508] sm:$0xff] %v1004_v58  ;;  %v377_v5 = vld [vmem:[%s2150_s4 + $0x550] sm:$0xff]  ;;  %1389 = vst [vmem:[%s2223_s18 + $0x510] sm:$0xff] %v1005_v39  ;;  %v1011_v62 = vmul.f32 %v2326_v47, %v375_v46  ;;  %v1012_v38 = vmul.f32 %v3612_v4, %v376_v32  ;;  %v378_v33 = vld [vmem:[%s2150_s4 + $0x558] sm:$0xff] }
  0xc6   : > { %1390 = vst [vmem:[%s2223_s18 + $0x518] sm:$0xff] %v1006_v34  ;;  %1391 = vst [vmem:[%s2223_s18 + $0x520] sm:$0xff] %v1007_v55  ;;  %v1013_v58 = vmul.f32 %v3613_v6, %v377_v5  ;;  %v379_v61 = vld [vmem:[%s2150_s4 + $0x560] sm:$0xff]  ;;  %v380_v0 = vld [vmem:[%s2150_s4 + $0x568] sm:$0xff]  ;;  %v1014_v39 = vmul.f32 %v3630_v29, %v378_v33 }
  0xc7   : > { %1392 = vst [vmem:[%s2223_s18 + $0x528] sm:$0xff] %v1008_v1  ;;  %1393 = vst [vmem:[%s2223_s18 + $0x530] sm:$0xff] %v1009_v31  ;;  %v1015_v34 = vmul.f32 %v3615_v8, %v379_v61  ;;  %v1016_v55 = vmul.f32 %v3616_v9, %v380_v0  ;;  %v381_v40 = vld [vmem:[%s2150_s4 + $0x570] sm:$0xff]  ;;  %v382_v46 = vld [vmem:[%s2150_s4 + $0x578] sm:$0xff] }
  0xc8   : > { %1394 = vst [vmem:[%s2223_s18 + $0x538] sm:$0xff] %v1010_v45  ;;  %v383_v32 = vld [vmem:[%s2150_s4 + $0x580] sm:$0xff]  ;;  %1395 = vst [vmem:[%s2223_s18 + $0x540] sm:$0xff] %v1011_v62  ;;  %v1017_v1 = vmul.f32 %v3631_v59, %v381_v40  ;;  %v1018_v31 = vmul.f32 %v3632_v21, %v382_v46  ;;  %v384_v5 = vld [vmem:[%s2150_s4 + $0x588] sm:$0xff] }
  0xc9   : > { %1396 = vst [vmem:[%s2223_s18 + $0x548] sm:$0xff] %v1012_v38  ;;  %1397 = vst [vmem:[%s2223_s18 + $0x550] sm:$0xff] %v1013_v58  ;;  %v1019_v45 = vmul.f32 %v2375_v37, %v383_v32  ;;  %v385_v33 = vld [vmem:[%s2150_s4 + $0x590] sm:$0xff]  ;;  %v386_v61 = vld [vmem:[%s2150_s4 + $0x598] sm:$0xff]  ;;  %v1020_v62 = vmul.f32 %v3633_v63, %v384_v5 }
  0xca   : > { %1398 = vst [vmem:[%s2223_s18 + $0x558] sm:$0xff] %v1014_v39  ;;  %1399 = vst [vmem:[%s2223_s18 + $0x560] sm:$0xff] %v1015_v34  ;;  %v1021_v38 = vmul.f32 %v3634_v53, %v385_v33  ;;  %v1022_v58 = vmul.f32 %v3635_v19, %v386_v61  ;;  %v387_v0 = vld [vmem:[%s2150_s4 + $0x5a0] sm:$0xff]  ;;  %v388_v40 = vld [vmem:[%s2150_s4 + $0x5a8] sm:$0xff] }
  0xcb   : > { %1400 = vst [vmem:[%s2223_s18 + $0x568] sm:$0xff] %v1016_v55  ;;  %v389_v46 = vld [vmem:[%s2150_s4 + $0x5b0] sm:$0xff]  ;;  %1401 = vst [vmem:[%s2223_s18 + $0x570] sm:$0xff] %v1017_v1  ;;  %v1023_v39 = vmul.f32 %v3622_v54, %v387_v0  ;;  %v1024_v34 = vmul.f32 %v3623_v60, %v388_v40  ;;  %v390_v32 = vld [vmem:[%s2150_s4 + $0x5b8] sm:$0xff] }
  0xcc   : > { %1402 = vst [vmem:[%s2223_s18 + $0x578] sm:$0xff] %v1018_v31  ;;  %1403 = vst [vmem:[%s2223_s18 + $0x580] sm:$0xff] %v1019_v45  ;;  %v1025_v55 = vmul.f32 %v3624_v30, %v389_v46  ;;  %v391_v5 = vld [vmem:[%s2150_s4 + $0x5c0] sm:$0xff]  ;;  %v392_v33 = vld [vmem:[%s2150_s4 + $0x5c8] sm:$0xff]  ;;  %v1026_v1 = vmul.f32 %v3636_v17, %v390_v32 }
  0xcd   : > { %1404 = vst [vmem:[%s2223_s18 + $0x588] sm:$0xff] %v1020_v62  ;;  %1405 = vst [vmem:[%s2223_s18 + $0x590] sm:$0xff] %v1021_v38  ;;  %v1027_v31 = vmul.f32 %v2429_v35, %v391_v5  ;;  %v1028_v45 = vmul.f32 %v2432_v36, %v392_v33  ;;  %v393_v61 = vld [vmem:[%s2150_s4 + $0x5d0] sm:$0xff]  ;;  %v394_v0 = vld [vmem:[%s2150_s4 + $0x5d8] sm:$0xff] }
  0xce   : > { %1406 = vst [vmem:[%s2223_s18 + $0x598] sm:$0xff] %v1022_v58  ;;  %v395_v40 = vld [vmem:[%s2150_s4 + $0x5e0] sm:$0xff]  ;;  %1407 = vst [vmem:[%s2223_s18 + $0x5a0] sm:$0xff] %v1023_v39  ;;  %v1029_v62 = vmul.f32 %v3626_v56, %v393_v61  ;;  %v1030_v38 = vmul.f32 %v3637_v52, %v394_v0  ;;  %v396_v46 = vld [vmem:[%s2150_s4 + $0x5e8] sm:$0xff] }
  0xcf   : > { %1408 = vst [vmem:[%s2223_s18 + $0x5a8] sm:$0xff] %v1024_v34  ;;  %1409 = vst [vmem:[%s2223_s18 + $0x5b0] sm:$0xff] %v1025_v55  ;;  %v1031_v58 = vmul.f32 %v2449_v2, %v395_v40  ;;  %v397_v32 = vld [vmem:[%s2150_s4 + $0x5f0] sm:$0xff]  ;;  %v398_v5 = vld [vmem:[%s2150_s4 + $0x5f8] sm:$0xff]  ;;  %v1032_v39 = vmul.f32 %v2452_v3, %v396_v46 }
  0xd0   : > { %1410 = vst [vmem:[%s2223_s18 + $0x5b8] sm:$0xff] %v1026_v1  ;;  %1411 = vst [vmem:[%s2223_s18 + $0x5c0] sm:$0xff] %v1027_v31  ;;  %v1033_v34 = vmul.f32 %v3628_v57, %v397_v32  ;;  %v1034_v55 = vmul.f32 %v3629_v7, %v398_v5  ;;  %v399_v33 = vld [vmem:[%s2150_s4 + $0x600] sm:$0xff]  ;;  %v400_v61 = vld [vmem:[%s2150_s4 + $0x608] sm:$0xff] }
  0xd1   : > { %1412 = vst [vmem:[%s2223_s18 + $0x5c8] sm:$0xff] %v1028_v45  ;;  %v401_v0 = vld [vmem:[%s2150_s4 + $0x610] sm:$0xff]  ;;  %1413 = vst [vmem:[%s2223_s18 + $0x5d0] sm:$0xff] %v1029_v62  ;;  %v1035_v1 = vmul.f32 %v2179_v13, %v399_v33  ;;  %v1036_v31 = vmul.f32 %v2182_v14, %v400_v61  ;;  %v402_v40 = vld [vmem:[%s2150_s4 + $0x618] sm:$0xff] }
  0xd2   : > { %1414 = vst [vmem:[%s2223_s18 + $0x5d8] sm:$0xff] %v1030_v38  ;;  %1415 = vst [vmem:[%s2223_s18 + $0x5e0] sm:$0xff] %v1031_v58  ;;  %v1037_v45 = vmul.f32 %v2186_v16, %v401_v0  ;;  %v403_v46 = vld [vmem:[%s2150_s4 + $0x620] sm:$0xff]  ;;  %v404_v32 = vld [vmem:[%s2150_s4 + $0x628] sm:$0xff]  ;;  %v1038_v62 = vmul.f32 %v2190_v18, %v402_v40 }
  0xd3   : > { %1416 = vst [vmem:[%s2223_s18 + $0x5e8] sm:$0xff] %v1032_v39  ;;  %1417 = vst [vmem:[%s2223_s18 + $0x5f0] sm:$0xff] %v1033_v34  ;;  %v1039_v38 = vmul.f32 %v2194_v20, %v403_v46  ;;  %v1040_v58 = vmul.f32 %v2198_v22, %v404_v32  ;;  %v405_v5 = vld [vmem:[%s2150_s4 + $0x630] sm:$0xff]  ;;  %v406_v33 = vld [vmem:[%s2150_s4 + $0x638] sm:$0xff] }
  0xd4   : > { %1418 = vst [vmem:[%s2223_s18 + $0x5f8] sm:$0xff] %v1034_v55  ;;  %v407_v61 = vld [vmem:[%s2150_s4 + $0x640] sm:$0xff]  ;;  %1419 = vst [vmem:[%s2223_s18 + $0x600] sm:$0xff] %v1035_v1  ;;  %v1041_v39 = vmul.f32 %v2202_v24, %v405_v5  ;;  %v1042_v34 = vmul.f32 %v2206_v26, %v406_v33  ;;  %v408_v0 = vld [vmem:[%s2150_s4 + $0x648] sm:$0xff] }
  0xd5   : > { %1420 = vst [vmem:[%s2223_s18 + $0x608] sm:$0xff] %v1036_v31  ;;  %1421 = vst [vmem:[%s2223_s18 + $0x610] sm:$0xff] %v1037_v45  ;;  %v1043_v55 = vmul.f32 %v2230_v41, %v407_v61  ;;  %v409_v40 = vld [vmem:[%s2150_s4 + $0x650] sm:$0xff]  ;;  %v410_v46 = vld [vmem:[%s2150_s4 + $0x658] sm:$0xff]  ;;  %v1044_v1 = vmul.f32 %v2233_v42, %v408_v0 }
  0xd6   : > { %1422 = vst [vmem:[%s2223_s18 + $0x618] sm:$0xff] %v1038_v62  ;;  %1423 = vst [vmem:[%s2223_s18 + $0x620] sm:$0xff] %v1039_v38  ;;  %v1045_v31 = vmul.f32 %v2236_v43, %v409_v40  ;;  %v1046_v45 = vmul.f32 %v2239_v44, %v410_v46  ;;  %v411_v32 = vld [vmem:[%s2150_s4 + $0x660] sm:$0xff]  ;;  %v412_v5 = vld [vmem:[%s2150_s4 + $0x668] sm:$0xff] }
  0xd7   : > { %1424 = vst [vmem:[%s2223_s18 + $0x628] sm:$0xff] %v1040_v58  ;;  %v413_v33 = vld [vmem:[%s2150_s4 + $0x670] sm:$0xff]  ;;  %1425 = vst [vmem:[%s2223_s18 + $0x630] sm:$0xff] %v1041_v39  ;;  %v1047_v62 = vmul.f32 %v2249_v48, %v411_v32  ;;  %v1048_v38 = vmul.f32 %v2252_v49, %v412_v5  ;;  %v414_v61 = vld [vmem:[%s2150_s4 + $0x678] sm:$0xff] }
  0xd8   : > { %1426 = vst [vmem:[%s2223_s18 + $0x638] sm:$0xff] %v1042_v34  ;;  %1427 = vst [vmem:[%s2223_s18 + $0x640] sm:$0xff] %v1043_v55  ;;  %v1049_v58 = vmul.f32 %v2255_v50, %v413_v33  ;;  %v415_v0 = vld [vmem:[%s2150_s4 + $0x680] sm:$0xff]  ;;  %v416_v40 = vld [vmem:[%s2150_s4 + $0x688] sm:$0xff]  ;;  %v1050_v39 = vmul.f32 %v2258_v51, %v414_v61 }
  0xd9   : > { %1428 = vst [vmem:[%s2223_s18 + $0x648] sm:$0xff] %v1044_v1  ;;  %1429 = vst [vmem:[%s2223_s18 + $0x650] sm:$0xff] %v1045_v31  ;;  %v1051_v34 = vmul.f32 %v2278_v10, %v415_v0  ;;  %v1052_v55 = vmul.f32 %v2281_v11, %v416_v40  ;;  %v417_v46 = vld [vmem:[%s2150_s4 + $0x690] sm:$0xff]  ;;  %v418_v32 = vld [vmem:[%s2150_s4 + $0x698] sm:$0xff] }
  0xda   : > { %1430 = vst [vmem:[%s2223_s18 + $0x658] sm:$0xff] %v1046_v45  ;;  %v419_v5 = vld [vmem:[%s2150_s4 + $0x6a0] sm:$0xff]  ;;  %1431 = vst [vmem:[%s2223_s18 + $0x660] sm:$0xff] %v1047_v62  ;;  %v1053_v1 = vmul.f32 %v2284_v12, %v417_v46  ;;  %v1054_v31 = vmul.f32 %v2287_v15, %v418_v32  ;;  %v420_v33 = vld [vmem:[%s2150_s4 + $0x6a8] sm:$0xff] }
  0xdb   : > { %1432 = vst [vmem:[%s2223_s18 + $0x668] sm:$0xff] %v1048_v38  ;;  %1433 = vst [vmem:[%s2223_s18 + $0x670] sm:$0xff] %v1049_v58  ;;  %v1055_v45 = vmul.f32 %v2297_v23, %v419_v5  ;;  %v421_v61 = vld [vmem:[%s2150_s4 + $0x6b0] sm:$0xff]  ;;  %v422_v0 = vld [vmem:[%s2150_s4 + $0x6b8] sm:$0xff]  ;;  %v1056_v62 = vmul.f32 %v2300_v25, %v420_v33 }
  0xdc   : > { %1434 = vst [vmem:[%s2223_s18 + $0x678] sm:$0xff] %v1050_v39  ;;  %1435 = vst [vmem:[%s2223_s18 + $0x680] sm:$0xff] %v1051_v34  ;;  %v1057_v38 = vmul.f32 %v2303_v27, %v421_v61  ;;  %v1058_v58 = vmul.f32 %v2306_v28, %v422_v0  ;;  %v423_v40 = vld [vmem:[%s2150_s4 + $0x6c0] sm:$0xff]  ;;  %v424_v46 = vld [vmem:[%s2150_s4 + $0x6c8] sm:$0xff] }
  0xdd   : > { %1436 = vst [vmem:[%s2223_s18 + $0x688] sm:$0xff] %v1052_v55  ;;  %v425_v32 = vld [vmem:[%s2150_s4 + $0x6d0] sm:$0xff]  ;;  %1437 = vst [vmem:[%s2223_s18 + $0x690] sm:$0xff] %v1053_v1  ;;  %v1059_v39 = vmul.f32 %v2326_v47, %v423_v40  ;;  %v1060_v34 = vmul.f32 %v3612_v4, %v424_v46  ;;  %v426_v5 = vld [vmem:[%s2150_s4 + $0x6d8] sm:$0xff] }
  0xde   : > { %1438 = vst [vmem:[%s2223_s18 + $0x698] sm:$0xff] %v1054_v31  ;;  %1439 = vst [vmem:[%s2223_s18 + $0x6a0] sm:$0xff] %v1055_v45  ;;  %v1061_v55 = vmul.f32 %v3613_v6, %v425_v32  ;;  %v427_v33 = vld [vmem:[%s2150_s4 + $0x6e0] sm:$0xff]  ;;  %v428_v61 = vld [vmem:[%s2150_s4 + $0x6e8] sm:$0xff]  ;;  %v1062_v1 = vmul.f32 %v3630_v29, %v426_v5 }
  0xdf   : > { %1440 = vst [vmem:[%s2223_s18 + $0x6a8] sm:$0xff] %v1056_v62  ;;  %1441 = vst [vmem:[%s2223_s18 + $0x6b0] sm:$0xff] %v1057_v38  ;;  %v1063_v31 = vmul.f32 %v3615_v8, %v427_v33  ;;  %v1064_v45 = vmul.f32 %v3616_v9, %v428_v61  ;;  %v429_v0 = vld [vmem:[%s2150_s4 + $0x6f0] sm:$0xff]  ;;  %v430_v40 = vld [vmem:[%s2150_s4 + $0x6f8] sm:$0xff] }
  0xe0   : > { %1442 = vst [vmem:[%s2223_s18 + $0x6b8] sm:$0xff] %v1058_v58  ;;  %v431_v46 = vld [vmem:[%s2150_s4 + $0x700] sm:$0xff]  ;;  %1443 = vst [vmem:[%s2223_s18 + $0x6c0] sm:$0xff] %v1059_v39  ;;  %v1065_v62 = vmul.f32 %v3631_v59, %v429_v0  ;;  %v1066_v38 = vmul.f32 %v3632_v21, %v430_v40  ;;  %v432_v32 = vld [vmem:[%s2150_s4 + $0x708] sm:$0xff] }
  0xe1   : > { %1444 = vst [vmem:[%s2223_s18 + $0x6c8] sm:$0xff] %v1060_v34  ;;  %1445 = vst [vmem:[%s2223_s18 + $0x6d0] sm:$0xff] %v1061_v55  ;;  %v1067_v58 = vmul.f32 %v2375_v37, %v431_v46  ;;  %v433_v5 = vld [vmem:[%s2150_s4 + $0x710] sm:$0xff]  ;;  %v434_v33 = vld [vmem:[%s2150_s4 + $0x718] sm:$0xff]  ;;  %v1068_v39 = vmul.f32 %v3633_v63, %v432_v32 }
  0xe2   : > { %1446 = vst [vmem:[%s2223_s18 + $0x6d8] sm:$0xff] %v1062_v1  ;;  %1447 = vst [vmem:[%s2223_s18 + $0x6e0] sm:$0xff] %v1063_v31  ;;  %v1069_v34 = vmul.f32 %v3634_v53, %v433_v5  ;;  %v1070_v55 = vmul.f32 %v3635_v19, %v434_v33  ;;  %v435_v61 = vld [vmem:[%s2150_s4 + $0x720] sm:$0xff]  ;;  %v436_v0 = vld [vmem:[%s2150_s4 + $0x728] sm:$0xff] }
  0xe3   : > { %1448 = vst [vmem:[%s2223_s18 + $0x6e8] sm:$0xff] %v1064_v45  ;;  %v437_v40 = vld [vmem:[%s2150_s4 + $0x730] sm:$0xff]  ;;  %1449 = vst [vmem:[%s2223_s18 + $0x6f0] sm:$0xff] %v1065_v62  ;;  %v1071_v1 = vmul.f32 %v3622_v54, %v435_v61  ;;  %v1072_v31 = vmul.f32 %v3623_v60, %v436_v0  ;;  %v438_v46 = vld [vmem:[%s2150_s4 + $0x738] sm:$0xff] }
  0xe4   : > { %1450 = vst [vmem:[%s2223_s18 + $0x6f8] sm:$0xff] %v1066_v38  ;;  %1451 = vst [vmem:[%s2223_s18 + $0x700] sm:$0xff] %v1067_v58  ;;  %v1073_v45 = vmul.f32 %v3624_v30, %v437_v40  ;;  %v439_v32 = vld [vmem:[%s2150_s4 + $0x740] sm:$0xff]  ;;  %v440_v5 = vld [vmem:[%s2150_s4 + $0x748] sm:$0xff]  ;;  %v1074_v62 = vmul.f32 %v3636_v17, %v438_v46 }
  0xe5   : > { %1452 = vst [vmem:[%s2223_s18 + $0x708] sm:$0xff] %v1068_v39  ;;  %1453 = vst [vmem:[%s2223_s18 + $0x710] sm:$0xff] %v1069_v34  ;;  %v1075_v38 = vmul.f32 %v2429_v35, %v439_v32  ;;  %v1076_v58 = vmul.f32 %v2432_v36, %v440_v5  ;;  %v441_v33 = vld [vmem:[%s2150_s4 + $0x750] sm:$0xff]  ;;  %v442_v61 = vld [vmem:[%s2150_s4 + $0x758] sm:$0xff] }
  0xe6   : > { %1454 = vst [vmem:[%s2223_s18 + $0x718] sm:$0xff] %v1070_v55  ;;  %v443_v0 = vld [vmem:[%s2150_s4 + $0x760] sm:$0xff]  ;;  %1455 = vst [vmem:[%s2223_s18 + $0x720] sm:$0xff] %v1071_v1  ;;  %v1077_v39 = vmul.f32 %v3626_v56, %v441_v33  ;;  %v1078_v34 = vmul.f32 %v3637_v52, %v442_v61  ;;  %v444_v40 = vld [vmem:[%s2150_s4 + $0x768] sm:$0xff] }
  0xe7   : > { %1456 = vst [vmem:[%s2223_s18 + $0x728] sm:$0xff] %v1072_v31  ;;  %1457 = vst [vmem:[%s2223_s18 + $0x730] sm:$0xff] %v1073_v45  ;;  %v1079_v55 = vmul.f32 %v2449_v2, %v443_v0  ;;  %v445_v46 = vld [vmem:[%s2150_s4 + $0x770] sm:$0xff]  ;;  %v446_v32 = vld [vmem:[%s2150_s4 + $0x778] sm:$0xff]  ;;  %v1080_v1 = vmul.f32 %v2452_v3, %v444_v40 }
  0xe8   : > { %1458 = vst [vmem:[%s2223_s18 + $0x738] sm:$0xff] %v1074_v62  ;;  %1459 = vst [vmem:[%s2223_s18 + $0x740] sm:$0xff] %v1075_v38  ;;  %v1081_v31 = vmul.f32 %v3628_v57, %v445_v46  ;;  %v1082_v45 = vmul.f32 %v3629_v7, %v446_v32  ;;  %v447_v5 = vld [vmem:[%s2150_s4 + $0x780] sm:$0xff]  ;;  %v448_v33 = vld [vmem:[%s2150_s4 + $0x788] sm:$0xff] }
  0xe9   : > { %1460 = vst [vmem:[%s2223_s18 + $0x748] sm:$0xff] %v1076_v58  ;;  %v449_v61 = vld [vmem:[%s2150_s4 + $0x790] sm:$0xff]  ;;  %1461 = vst [vmem:[%s2223_s18 + $0x750] sm:$0xff] %v1077_v39  ;;  %v1083_v62 = vmul.f32 %v2179_v13, %v447_v5  ;;  %v1084_v38 = vmul.f32 %v2182_v14, %v448_v33  ;;  %v450_v0 = vld [vmem:[%s2150_s4 + $0x798] sm:$0xff] }
  0xea   : > { %1462 = vst [vmem:[%s2223_s18 + $0x758] sm:$0xff] %v1078_v34  ;;  %1463 = vst [vmem:[%s2223_s18 + $0x760] sm:$0xff] %v1079_v55  ;;  %v1085_v58 = vmul.f32 %v2186_v16, %v449_v61  ;;  %v451_v40 = vld [vmem:[%s2150_s4 + $0x7a0] sm:$0xff]  ;;  %v452_v46 = vld [vmem:[%s2150_s4 + $0x7a8] sm:$0xff]  ;;  %v1086_v39 = vmul.f32 %v2190_v18, %v450_v0 }
  0xeb   : > { %1464 = vst [vmem:[%s2223_s18 + $0x768] sm:$0xff] %v1080_v1  ;;  %1465 = vst [vmem:[%s2223_s18 + $0x770] sm:$0xff] %v1081_v31  ;;  %v1087_v34 = vmul.f32 %v2194_v20, %v451_v40  ;;  %v1088_v55 = vmul.f32 %v2198_v22, %v452_v46  ;;  %v453_v32 = vld [vmem:[%s2150_s4 + $0x7b0] sm:$0xff]  ;;  %v454_v5 = vld [vmem:[%s2150_s4 + $0x7b8] sm:$0xff] }
  0xec   : > { %1466 = vst [vmem:[%s2223_s18 + $0x778] sm:$0xff] %v1082_v45  ;;  %v455_v33 = vld [vmem:[%s2150_s4 + $0x7c0] sm:$0xff]  ;;  %1467 = vst [vmem:[%s2223_s18 + $0x780] sm:$0xff] %v1083_v62  ;;  %v1089_v1 = vmul.f32 %v2202_v24, %v453_v32  ;;  %v1090_v31 = vmul.f32 %v2206_v26, %v454_v5  ;;  %v456_v61 = vld [vmem:[%s2150_s4 + $0x7c8] sm:$0xff] }
  0xed   : > { %1468 = vst [vmem:[%s2223_s18 + $0x788] sm:$0xff] %v1084_v38  ;;  %1469 = vst [vmem:[%s2223_s18 + $0x790] sm:$0xff] %v1085_v58  ;;  %v1091_v45 = vmul.f32 %v2230_v41, %v455_v33  ;;  %v457_v0 = vld [vmem:[%s2150_s4 + $0x7d0] sm:$0xff]  ;;  %v458_v40 = vld [vmem:[%s2150_s4 + $0x7d8] sm:$0xff]  ;;  %v1092_v62 = vmul.f32 %v2233_v42, %v456_v61 }
  0xee   : > { %1470 = vst [vmem:[%s2223_s18 + $0x798] sm:$0xff] %v1086_v39  ;;  %1471 = vst [vmem:[%s2223_s18 + $0x7a0] sm:$0xff] %v1087_v34  ;;  %v1093_v38 = vmul.f32 %v2236_v43, %v457_v0  ;;  %v1094_v58 = vmul.f32 %v2239_v44, %v458_v40  ;;  %v459_v46 = vld [vmem:[%s2150_s4 + $0x7e0] sm:$0xff]  ;;  %v460_v32 = vld [vmem:[%s2150_s4 + $0x7e8] sm:$0xff] }
  0xef   : > { %1472 = vst [vmem:[%s2223_s18 + $0x7a8] sm:$0xff] %v1088_v55  ;;  %v461_v5 = vld [vmem:[%s2150_s4 + $0x7f0] sm:$0xff]  ;;  %1473 = vst [vmem:[%s2223_s18 + $0x7b0] sm:$0xff] %v1089_v1  ;;  %v1095_v39 = vmul.f32 %v2249_v48, %v459_v46  ;;  %v1096_v34 = vmul.f32 %v2252_v49, %v460_v32  ;;  %v462_v33 = vld [vmem:[%s2150_s4 + $0x7f8] sm:$0xff] }
  0xf0   : > { %1474 = vst [vmem:[%s2223_s18 + $0x7b8] sm:$0xff] %v1090_v31  ;;  %1475 = vst [vmem:[%s2223_s18 + $0x7c0] sm:$0xff] %v1091_v45  ;;  %v1097_v55 = vmul.f32 %v2255_v50, %v461_v5  ;;  %v463_v61 = vld [vmem:[%s2150_s4 + $0x800] sm:$0xff]  ;;  %v464_v0 = vld [vmem:[%s2150_s4 + $0x808] sm:$0xff]  ;;  %v1098_v1 = vmul.f32 %v2258_v51, %v462_v33 }
  0xf1   : > { %1476 = vst [vmem:[%s2223_s18 + $0x7c8] sm:$0xff] %v1092_v62  ;;  %1477 = vst [vmem:[%s2223_s18 + $0x7d0] sm:$0xff] %v1093_v38  ;;  %v1099_v31 = vmul.f32 %v2278_v10, %v463_v61  ;;  %v1100_v45 = vmul.f32 %v2281_v11, %v464_v0  ;;  %v465_v40 = vld [vmem:[%s2150_s4 + $0x810] sm:$0xff]  ;;  %v466_v46 = vld [vmem:[%s2150_s4 + $0x818] sm:$0xff] }
  0xf2   : > { %1478 = vst [vmem:[%s2223_s18 + $0x7d8] sm:$0xff] %v1094_v58  ;;  %v467_v32 = vld [vmem:[%s2150_s4 + $0x820] sm:$0xff]  ;;  %1479 = vst [vmem:[%s2223_s18 + $0x7e0] sm:$0xff] %v1095_v39  ;;  %v1101_v62 = vmul.f32 %v2284_v12, %v465_v40  ;;  %v1102_v38 = vmul.f32 %v2287_v15, %v466_v46  ;;  %v468_v5 = vld [vmem:[%s2150_s4 + $0x828] sm:$0xff] }
  0xf3   : > { %1480 = vst [vmem:[%s2223_s18 + $0x7e8] sm:$0xff] %v1096_v34  ;;  %1481 = vst [vmem:[%s2223_s18 + $0x7f0] sm:$0xff] %v1097_v55  ;;  %v1103_v58 = vmul.f32 %v2297_v23, %v467_v32  ;;  %v469_v33 = vld [vmem:[%s2150_s4 + $0x830] sm:$0xff]  ;;  %v470_v61 = vld [vmem:[%s2150_s4 + $0x838] sm:$0xff]  ;;  %v1104_v39 = vmul.f32 %v2300_v25, %v468_v5 }
  0xf4   : > { %1482 = vst [vmem:[%s2223_s18 + $0x7f8] sm:$0xff] %v1098_v1  ;;  %1483 = vst [vmem:[%s2223_s18 + $0x800] sm:$0xff] %v1099_v31  ;;  %v1105_v34 = vmul.f32 %v2303_v27, %v469_v33  ;;  %v1106_v55 = vmul.f32 %v2306_v28, %v470_v61  ;;  %v471_v0 = vld [vmem:[%s2150_s4 + $0x840] sm:$0xff]  ;;  %v472_v40 = vld [vmem:[%s2150_s4 + $0x848] sm:$0xff] }
  0xf5   : > { %1484 = vst [vmem:[%s2223_s18 + $0x808] sm:$0xff] %v1100_v45  ;;  %v473_v46 = vld [vmem:[%s2150_s4 + $0x850] sm:$0xff]  ;;  %1485 = vst [vmem:[%s2223_s18 + $0x810] sm:$0xff] %v1101_v62  ;;  %v1107_v1 = vmul.f32 %v2326_v47, %v471_v0  ;;  %v1108_v31 = vmul.f32 %v3612_v4, %v472_v40  ;;  %v474_v32 = vld [vmem:[%s2150_s4 + $0x858] sm:$0xff] }
  0xf6   : > { %1486 = vst [vmem:[%s2223_s18 + $0x818] sm:$0xff] %v1102_v38  ;;  %1487 = vst [vmem:[%s2223_s18 + $0x820] sm:$0xff] %v1103_v58  ;;  %v1109_v45 = vmul.f32 %v3613_v6, %v473_v46  ;;  %v475_v5 = vld [vmem:[%s2150_s4 + $0x860] sm:$0xff]  ;;  %v476_v33 = vld [vmem:[%s2150_s4 + $0x868] sm:$0xff]  ;;  %v1110_v62 = vmul.f32 %v3630_v29, %v474_v32 }
  0xf7   : > { %1488 = vst [vmem:[%s2223_s18 + $0x828] sm:$0xff] %v1104_v39  ;;  %1489 = vst [vmem:[%s2223_s18 + $0x830] sm:$0xff] %v1105_v34  ;;  %v1111_v38 = vmul.f32 %v3615_v8, %v475_v5  ;;  %v1112_v58 = vmul.f32 %v3616_v9, %v476_v33  ;;  %v477_v61 = vld [vmem:[%s2150_s4 + $0x870] sm:$0xff]  ;;  %v478_v0 = vld [vmem:[%s2150_s4 + $0x878] sm:$0xff] }
  0xf8   : > { %1490 = vst [vmem:[%s2223_s18 + $0x838] sm:$0xff] %v1106_v55  ;;  %v479_v40 = vld [vmem:[%s2150_s4 + $0x880] sm:$0xff]  ;;  %1491 = vst [vmem:[%s2223_s18 + $0x840] sm:$0xff] %v1107_v1  ;;  %v1113_v39 = vmul.f32 %v3631_v59, %v477_v61  ;;  %v1114_v34 = vmul.f32 %v3632_v21, %v478_v0  ;;  %v480_v46 = vld [vmem:[%s2150_s4 + $0x888] sm:$0xff] }
  0xf9   : > { %1492 = vst [vmem:[%s2223_s18 + $0x848] sm:$0xff] %v1108_v31  ;;  %1493 = vst [vmem:[%s2223_s18 + $0x850] sm:$0xff] %v1109_v45  ;;  %v1115_v55 = vmul.f32 %v2375_v37, %v479_v40  ;;  %v481_v32 = vld [vmem:[%s2150_s4 + $0x890] sm:$0xff]  ;;  %v482_v5 = vld [vmem:[%s2150_s4 + $0x898] sm:$0xff]  ;;  %v1116_v1 = vmul.f32 %v3633_v63, %v480_v46 }
  0xfa   : > { %1494 = vst [vmem:[%s2223_s18 + $0x858] sm:$0xff] %v1110_v62  ;;  %1495 = vst [vmem:[%s2223_s18 + $0x860] sm:$0xff] %v1111_v38  ;;  %v1117_v31 = vmul.f32 %v3634_v53, %v481_v32  ;;  %v1118_v45 = vmul.f32 %v3635_v19, %v482_v5  ;;  %v483_v33 = vld [vmem:[%s2150_s4 + $0x8a0] sm:$0xff]  ;;  %v484_v61 = vld [vmem:[%s2150_s4 + $0x8a8] sm:$0xff] }
  0xfb   : > { %1496 = vst [vmem:[%s2223_s18 + $0x868] sm:$0xff] %v1112_v58  ;;  %v485_v0 = vld [vmem:[%s2150_s4 + $0x8b0] sm:$0xff]  ;;  %1497 = vst [vmem:[%s2223_s18 + $0x870] sm:$0xff] %v1113_v39  ;;  %v1119_v62 = vmul.f32 %v3622_v54, %v483_v33  ;;  %v1120_v38 = vmul.f32 %v3623_v60, %v484_v61  ;;  %v486_v40 = vld [vmem:[%s2150_s4 + $0x8b8] sm:$0xff] }
  0xfc   : > { %1498 = vst [vmem:[%s2223_s18 + $0x878] sm:$0xff] %v1114_v34  ;;  %1499 = vst [vmem:[%s2223_s18 + $0x880] sm:$0xff] %v1115_v55  ;;  %v1121_v58 = vmul.f32 %v3624_v30, %v485_v0  ;;  %v487_v46 = vld [vmem:[%s2150_s4 + $0x8c0] sm:$0xff]  ;;  %v488_v32 = vld [vmem:[%s2150_s4 + $0x8c8] sm:$0xff]  ;;  %v1122_v39 = vmul.f32 %v3636_v17, %v486_v40 }
  0xfd   : > { %1500 = vst [vmem:[%s2223_s18 + $0x888] sm:$0xff] %v1116_v1  ;;  %1501 = vst [vmem:[%s2223_s18 + $0x890] sm:$0xff] %v1117_v31  ;;  %v1123_v34 = vmul.f32 %v2429_v35, %v487_v46  ;;  %v1124_v55 = vmul.f32 %v2432_v36, %v488_v32  ;;  %v489_v5 = vld [vmem:[%s2150_s4 + $0x8d0] sm:$0xff]  ;;  %v490_v33 = vld [vmem:[%s2150_s4 + $0x8d8] sm:$0xff] }
  0xfe   : > { %1502 = vst [vmem:[%s2223_s18 + $0x898] sm:$0xff] %v1118_v45  ;;  %v491_v61 = vld [vmem:[%s2150_s4 + $0x8e0] sm:$0xff]  ;;  %1503 = vst [vmem:[%s2223_s18 + $0x8a0] sm:$0xff] %v1119_v62  ;;  %v1125_v1 = vmul.f32 %v3626_v56, %v489_v5  ;;  %v1126_v31 = vmul.f32 %v3637_v52, %v490_v33  ;;  %v492_v0 = vld [vmem:[%s2150_s4 + $0x8e8] sm:$0xff] }
  0xff   : > { %1504 = vst [vmem:[%s2223_s18 + $0x8a8] sm:$0xff] %v1120_v38  ;;  %1505 = vst [vmem:[%s2223_s18 + $0x8b0] sm:$0xff] %v1121_v58  ;;  %v1127_v45 = vmul.f32 %v2449_v2, %v491_v61  ;;  %v493_v40 = vld [vmem:[%s2150_s4 + $0x8f0] sm:$0xff]  ;;  %v494_v46 = vld [vmem:[%s2150_s4 + $0x8f8] sm:$0xff]  ;;  %v1128_v62 = vmul.f32 %v2452_v3, %v492_v0 }
 0x100   : > { %1506 = vst [vmem:[%s2223_s18 + $0x8b8] sm:$0xff] %v1122_v39  ;;  %1507 = vst [vmem:[%s2223_s18 + $0x8c0] sm:$0xff] %v1123_v34  ;;  %v1129_v38 = vmul.f32 %v3628_v57, %v493_v40  ;;  %v1130_v58 = vmul.f32 %v3629_v7, %v494_v46  ;;  %v495_v32 = vld [vmem:[%s2150_s4 + $0x900] sm:$0xff]  ;;  %v496_v5 = vld [vmem:[%s2150_s4 + $0x908] sm:$0xff] }
 0x101   : > { %1508 = vst [vmem:[%s2223_s18 + $0x8c8] sm:$0xff] %v1124_v55  ;;  %v497_v33 = vld [vmem:[%s2150_s4 + $0x910] sm:$0xff]  ;;  %1509 = vst [vmem:[%s2223_s18 + $0x8d0] sm:$0xff] %v1125_v1  ;;  %v1131_v39 = vmul.f32 %v2179_v13, %v495_v32  ;;  %v1132_v34 = vmul.f32 %v2182_v14, %v496_v5  ;;  %v498_v61 = vld [vmem:[%s2150_s4 + $0x918] sm:$0xff] }
 0x102   : > { %1510 = vst [vmem:[%s2223_s18 + $0x8d8] sm:$0xff] %v1126_v31  ;;  %1511 = vst [vmem:[%s2223_s18 + $0x8e0] sm:$0xff] %v1127_v45  ;;  %v1133_v55 = vmul.f32 %v2186_v16, %v497_v33  ;;  %v499_v0 = vld [vmem:[%s2150_s4 + $0x920] sm:$0xff]  ;;  %v500_v40 = vld [vmem:[%s2150_s4 + $0x928] sm:$0xff]  ;;  %v1134_v1 = vmul.f32 %v2190_v18, %v498_v61 }
 0x103   : > { %1512 = vst [vmem:[%s2223_s18 + $0x8e8] sm:$0xff] %v1128_v62  ;;  %1513 = vst [vmem:[%s2223_s18 + $0x8f0] sm:$0xff] %v1129_v38  ;;  %v1135_v31 = vmul.f32 %v2194_v20, %v499_v0  ;;  %v1136_v45 = vmul.f32 %v2198_v22, %v500_v40  ;;  %v501_v46 = vld [vmem:[%s2150_s4 + $0x930] sm:$0xff]  ;;  %v502_v32 = vld [vmem:[%s2150_s4 + $0x938] sm:$0xff] }
 0x104   : > { %1514 = vst [vmem:[%s2223_s18 + $0x8f8] sm:$0xff] %v1130_v58  ;;  %v503_v5 = vld [vmem:[%s2150_s4 + $0x940] sm:$0xff]  ;;  %1515 = vst [vmem:[%s2223_s18 + $0x900] sm:$0xff] %v1131_v39  ;;  %v1137_v62 = vmul.f32 %v2202_v24, %v501_v46  ;;  %v1138_v38 = vmul.f32 %v2206_v26, %v502_v32  ;;  %v504_v33 = vld [vmem:[%s2150_s4 + $0x948] sm:$0xff] }
 0x105   : > { %1516 = vst [vmem:[%s2223_s18 + $0x908] sm:$0xff] %v1132_v34  ;;  %1517 = vst [vmem:[%s2223_s18 + $0x910] sm:$0xff] %v1133_v55  ;;  %v1139_v58 = vmul.f32 %v2230_v41, %v503_v5  ;;  %v505_v61 = vld [vmem:[%s2150_s4 + $0x950] sm:$0xff]  ;;  %v506_v0 = vld [vmem:[%s2150_s4 + $0x958] sm:$0xff]  ;;  %v1140_v39 = vmul.f32 %v2233_v42, %v504_v33 }
 0x106   : > { %1518 = vst [vmem:[%s2223_s18 + $0x918] sm:$0xff] %v1134_v1  ;;  %1519 = vst [vmem:[%s2223_s18 + $0x920] sm:$0xff] %v1135_v31  ;;  %v1141_v34 = vmul.f32 %v2236_v43, %v505_v61  ;;  %v1142_v55 = vmul.f32 %v2239_v44, %v506_v0  ;;  %v507_v40 = vld [vmem:[%s2150_s4 + $0x960] sm:$0xff]  ;;  %v508_v46 = vld [vmem:[%s2150_s4 + $0x968] sm:$0xff] }
 0x107   : > { %1520 = vst [vmem:[%s2223_s18 + $0x928] sm:$0xff] %v1136_v45  ;;  %v509_v32 = vld [vmem:[%s2150_s4 + $0x970] sm:$0xff]  ;;  %1521 = vst [vmem:[%s2223_s18 + $0x930] sm:$0xff] %v1137_v62  ;;  %v1143_v1 = vmul.f32 %v2249_v48, %v507_v40  ;;  %v1144_v31 = vmul.f32 %v2252_v49, %v508_v46  ;;  %v510_v5 = vld [vmem:[%s2150_s4 + $0x978] sm:$0xff] }
 0x108   : > { %1522 = vst [vmem:[%s2223_s18 + $0x938] sm:$0xff] %v1138_v38  ;;  %1523 = vst [vmem:[%s2223_s18 + $0x940] sm:$0xff] %v1139_v58  ;;  %v1145_v45 = vmul.f32 %v2255_v50, %v509_v32  ;;  %v511_v33 = vld [vmem:[%s2150_s4 + $0x980] sm:$0xff]  ;;  %v512_v61 = vld [vmem:[%s2150_s4 + $0x988] sm:$0xff]  ;;  %v1146_v62 = vmul.f32 %v2258_v51, %v510_v5 }
 0x109   : > { %1524 = vst [vmem:[%s2223_s18 + $0x948] sm:$0xff] %v1140_v39  ;;  %1525 = vst [vmem:[%s2223_s18 + $0x950] sm:$0xff] %v1141_v34  ;;  %v1147_v38 = vmul.f32 %v2278_v10, %v511_v33  ;;  %v1148_v58 = vmul.f32 %v2281_v11, %v512_v61  ;;  %v513_v0 = vld [vmem:[%s2150_s4 + $0x990] sm:$0xff]  ;;  %v514_v40 = vld [vmem:[%s2150_s4 + $0x998] sm:$0xff] }
 0x10a   : > { %1526 = vst [vmem:[%s2223_s18 + $0x958] sm:$0xff] %v1142_v55  ;;  %v515_v46 = vld [vmem:[%s2150_s4 + $0x9a0] sm:$0xff]  ;;  %1527 = vst [vmem:[%s2223_s18 + $0x960] sm:$0xff] %v1143_v1  ;;  %v1149_v39 = vmul.f32 %v2284_v12, %v513_v0  ;;  %v1150_v34 = vmul.f32 %v2287_v15, %v514_v40  ;;  %v516_v32 = vld [vmem:[%s2150_s4 + $0x9a8] sm:$0xff] }
 0x10b   : > { %1528 = vst [vmem:[%s2223_s18 + $0x968] sm:$0xff] %v1144_v31  ;;  %1529 = vst [vmem:[%s2223_s18 + $0x970] sm:$0xff] %v1145_v45  ;;  %v1151_v55 = vmul.f32 %v2297_v23, %v515_v46  ;;  %v517_v5 = vld [vmem:[%s2150_s4 + $0x9b0] sm:$0xff]  ;;  %v518_v33 = vld [vmem:[%s2150_s4 + $0x9b8] sm:$0xff]  ;;  %v1152_v1 = vmul.f32 %v2300_v25, %v516_v32 }
 0x10c   : > { %1530 = vst [vmem:[%s2223_s18 + $0x978] sm:$0xff] %v1146_v62  ;;  %1531 = vst [vmem:[%s2223_s18 + $0x980] sm:$0xff] %v1147_v38  ;;  %v1153_v31 = vmul.f32 %v2303_v27, %v517_v5  ;;  %v1154_v45 = vmul.f32 %v2306_v28, %v518_v33  ;;  %v519_v61 = vld [vmem:[%s2150_s4 + $0x9c0] sm:$0xff]  ;;  %v520_v0 = vld [vmem:[%s2150_s4 + $0x9c8] sm:$0xff] }
 0x10d   : > { %1532 = vst [vmem:[%s2223_s18 + $0x988] sm:$0xff] %v1148_v58  ;;  %v521_v40 = vld [vmem:[%s2150_s4 + $0x9d0] sm:$0xff]  ;;  %1533 = vst [vmem:[%s2223_s18 + $0x990] sm:$0xff] %v1149_v39  ;;  %v1155_v62 = vmul.f32 %v2326_v47, %v519_v61  ;;  %v1156_v38 = vmul.f32 %v3612_v4, %v520_v0  ;;  %v522_v46 = vld [vmem:[%s2150_s4 + $0x9d8] sm:$0xff] }
 0x10e   : > { %1534 = vst [vmem:[%s2223_s18 + $0x998] sm:$0xff] %v1150_v34  ;;  %1535 = vst [vmem:[%s2223_s18 + $0x9a0] sm:$0xff] %v1151_v55  ;;  %v1157_v58 = vmul.f32 %v3613_v6, %v521_v40  ;;  %v523_v32 = vld [vmem:[%s2150_s4 + $0x9e0] sm:$0xff]  ;;  %v524_v5 = vld [vmem:[%s2150_s4 + $0x9e8] sm:$0xff]  ;;  %v1158_v39 = vmul.f32 %v3630_v29, %v522_v46 }
 0x10f   : > { %1536 = vst [vmem:[%s2223_s18 + $0x9a8] sm:$0xff] %v1152_v1  ;;  %1537 = vst [vmem:[%s2223_s18 + $0x9b0] sm:$0xff] %v1153_v31  ;;  %v1159_v34 = vmul.f32 %v3615_v8, %v523_v32  ;;  %v1160_v55 = vmul.f32 %v3616_v9, %v524_v5  ;;  %v525_v33 = vld [vmem:[%s2150_s4 + $0x9f0] sm:$0xff]  ;;  %v526_v61 = vld [vmem:[%s2150_s4 + $0x9f8] sm:$0xff] }
 0x110   : > { %1538 = vst [vmem:[%s2223_s18 + $0x9b8] sm:$0xff] %v1154_v45  ;;  %v527_v0 = vld [vmem:[%s2150_s4 + $0xa00] sm:$0xff]  ;;  %1539 = vst [vmem:[%s2223_s18 + $0x9c0] sm:$0xff] %v1155_v62  ;;  %v1161_v1 = vmul.f32 %v3631_v59, %v525_v33  ;;  %v1162_v31 = vmul.f32 %v3632_v21, %v526_v61  ;;  %v528_v40 = vld [vmem:[%s2150_s4 + $0xa08] sm:$0xff] }
 0x111   : > { %1540 = vst [vmem:[%s2223_s18 + $0x9c8] sm:$0xff] %v1156_v38  ;;  %1541 = vst [vmem:[%s2223_s18 + $0x9d0] sm:$0xff] %v1157_v58  ;;  %v1163_v45 = vmul.f32 %v2375_v37, %v527_v0  ;;  %v529_v46 = vld [vmem:[%s2150_s4 + $0xa10] sm:$0xff]  ;;  %v530_v32 = vld [vmem:[%s2150_s4 + $0xa18] sm:$0xff]  ;;  %v1164_v62 = vmul.f32 %v3633_v63, %v528_v40 }
 0x112   : > { %1542 = vst [vmem:[%s2223_s18 + $0x9d8] sm:$0xff] %v1158_v39  ;;  %1543 = vst [vmem:[%s2223_s18 + $0x9e0] sm:$0xff] %v1159_v34  ;;  %v1165_v38 = vmul.f32 %v3634_v53, %v529_v46  ;;  %v1166_v58 = vmul.f32 %v3635_v19, %v530_v32  ;;  %v531_v5 = vld [vmem:[%s2150_s4 + $0xa20] sm:$0xff]  ;;  %v532_v33 = vld [vmem:[%s2150_s4 + $0xa28] sm:$0xff] }
 0x113   : > { %1544 = vst [vmem:[%s2223_s18 + $0x9e8] sm:$0xff] %v1160_v55  ;;  %v533_v61 = vld [vmem:[%s2150_s4 + $0xa30] sm:$0xff]  ;;  %1545 = vst [vmem:[%s2223_s18 + $0x9f0] sm:$0xff] %v1161_v1  ;;  %v1167_v39 = vmul.f32 %v3622_v54, %v531_v5  ;;  %v1168_v34 = vmul.f32 %v3623_v60, %v532_v33  ;;  %v534_v0 = vld [vmem:[%s2150_s4 + $0xa38] sm:$0xff] }
 0x114   : > { %1546 = vst [vmem:[%s2223_s18 + $0x9f8] sm:$0xff] %v1162_v31  ;;  %1547 = vst [vmem:[%s2223_s18 + $0xa00] sm:$0xff] %v1163_v45  ;;  %v1169_v55 = vmul.f32 %v3624_v30, %v533_v61  ;;  %v535_v40 = vld [vmem:[%s2150_s4 + $0xa40] sm:$0xff]  ;;  %v536_v46 = vld [vmem:[%s2150_s4 + $0xa48] sm:$0xff]  ;;  %v1170_v1 = vmul.f32 %v3636_v17, %v534_v0 }
 0x115   : > { %1548 = vst [vmem:[%s2223_s18 + $0xa08] sm:$0xff] %v1164_v62  ;;  %1549 = vst [vmem:[%s2223_s18 + $0xa10] sm:$0xff] %v1165_v38  ;;  %v1171_v31 = vmul.f32 %v2429_v35, %v535_v40  ;;  %v1172_v45 = vmul.f32 %v2432_v36, %v536_v46  ;;  %v537_v32 = vld [vmem:[%s2150_s4 + $0xa50] sm:$0xff]  ;;  %v538_v5 = vld [vmem:[%s2150_s4 + $0xa58] sm:$0xff] }
 0x116   : > { %1550 = vst [vmem:[%s2223_s18 + $0xa18] sm:$0xff] %v1166_v58  ;;  %v539_v33 = vld [vmem:[%s2150_s4 + $0xa60] sm:$0xff]  ;;  %1551 = vst [vmem:[%s2223_s18 + $0xa20] sm:$0xff] %v1167_v39  ;;  %v1173_v62 = vmul.f32 %v3626_v56, %v537_v32  ;;  %v1174_v38 = vmul.f32 %v3637_v52, %v538_v5  ;;  %v540_v61 = vld [vmem:[%s2150_s4 + $0xa68] sm:$0xff] }
 0x117   : > { %1552 = vst [vmem:[%s2223_s18 + $0xa28] sm:$0xff] %v1168_v34  ;;  %1553 = vst [vmem:[%s2223_s18 + $0xa30] sm:$0xff] %v1169_v55  ;;  %v1175_v58 = vmul.f32 %v2449_v2, %v539_v33  ;;  %v541_v0 = vld [vmem:[%s2150_s4 + $0xa70] sm:$0xff]  ;;  %v542_v40 = vld [vmem:[%s2150_s4 + $0xa78] sm:$0xff]  ;;  %v1176_v39 = vmul.f32 %v2452_v3, %v540_v61 }
 0x118   : > { %1554 = vst [vmem:[%s2223_s18 + $0xa38] sm:$0xff] %v1170_v1  ;;  %1555 = vst [vmem:[%s2223_s18 + $0xa40] sm:$0xff] %v1171_v31  ;;  %v1177_v34 = vmul.f32 %v3628_v57, %v541_v0  ;;  %v1178_v55 = vmul.f32 %v3629_v7, %v542_v40  ;;  %v543_v46 = vld [vmem:[%s2150_s4 + $0xa80] sm:$0xff]  ;;  %v544_v32 = vld [vmem:[%s2150_s4 + $0xa88] sm:$0xff] }
 0x119   : > { %1556 = vst [vmem:[%s2223_s18 + $0xa48] sm:$0xff] %v1172_v45  ;;  %v545_v5 = vld [vmem:[%s2150_s4 + $0xa90] sm:$0xff]  ;;  %1557 = vst [vmem:[%s2223_s18 + $0xa50] sm:$0xff] %v1173_v62  ;;  %v1179_v1 = vmul.f32 %v2179_v13, %v543_v46  ;;  %v1180_v31 = vmul.f32 %v2182_v14, %v544_v32  ;;  %v546_v33 = vld [vmem:[%s2150_s4 + $0xa98] sm:$0xff] }
 0x11a   : > { %1558 = vst [vmem:[%s2223_s18 + $0xa58] sm:$0xff] %v1174_v38  ;;  %1559 = vst [vmem:[%s2223_s18 + $0xa60] sm:$0xff] %v1175_v58  ;;  %v1181_v45 = vmul.f32 %v2186_v16, %v545_v5  ;;  %v547_v61 = vld [vmem:[%s2150_s4 + $0xaa0] sm:$0xff]  ;;  %v548_v0 = vld [vmem:[%s2150_s4 + $0xaa8] sm:$0xff]  ;;  %v1182_v62 = vmul.f32 %v2190_v18, %v546_v33 }
 0x11b   : > { %1560 = vst [vmem:[%s2223_s18 + $0xa68] sm:$0xff] %v1176_v39  ;;  %1561 = vst [vmem:[%s2223_s18 + $0xa70] sm:$0xff] %v1177_v34  ;;  %v1183_v13 = vmul.f32 %v2194_v20, %v547_v61  ;;  %v1184_v14 = vmul.f32 %v2198_v22, %v548_v0  ;;  %v549_v38 = vld [vmem:[%s2150_s4 + $0xab0] sm:$0xff]  ;;  %v550_v16 = vld [vmem:[%s2150_s4 + $0xab8] sm:$0xff] }
 0x11c   : > { %1562 = vst [vmem:[%s2223_s18 + $0xa78] sm:$0xff] %v1178_v55  ;;  %v551_v58 = vld [vmem:[%s2150_s4 + $0xac0] sm:$0xff]  ;;  %1563 = vst [vmem:[%s2223_s18 + $0xa80] sm:$0xff] %v1179_v1  ;;  %v1185_v40 = vmul.f32 %v2202_v24, %v549_v38  ;;  %v1186_v18 = vmul.f32 %v2206_v26, %v550_v16  ;;  %v552_v39 = vld [vmem:[%s2150_s4 + $0xac8] sm:$0xff] }
 0x11d   : > { %1564 = vst [vmem:[%s2223_s18 + $0xa88] sm:$0xff] %v1180_v31  ;;  %1565 = vst [vmem:[%s2223_s18 + $0xa90] sm:$0xff] %v1181_v45  ;;  %v1187_v20 = vmul.f32 %v2230_v41, %v551_v58  ;;  %v553_v22 = vld [vmem:[%s2150_s4 + $0xad0] sm:$0xff]  ;;  %v554_v34 = vld [vmem:[%s2150_s4 + $0xad8] sm:$0xff]  ;;  %v1188_v55 = vmul.f32 %v2233_v42, %v552_v39 }
 0x11e   : > { %1566 = vst [vmem:[%s2223_s18 + $0xa98] sm:$0xff] %v1182_v62  ;;  %1567 = vst [vmem:[%s2223_s18 + $0xaa0] sm:$0xff] %v1183_v13  ;;  %v1189_v24 = vmul.f32 %v2236_v43, %v553_v22  ;;  %v1190_v26 = vmul.f32 %v2239_v44, %v554_v34  ;;  %v555_v46 = vld [vmem:[%s2150_s4 + $0xae0] sm:$0xff]  ;;  %v556_v41 = vld [vmem:[%s2150_s4 + $0xae8] sm:$0xff] }
 0x11f   : > { %1568 = vst [vmem:[%s2223_s18 + $0xaa8] sm:$0xff] %v1184_v14  ;;  %v557_v32 = vld [vmem:[%s2150_s4 + $0xaf0] sm:$0xff]  ;;  %1569 = vst [vmem:[%s2223_s18 + $0xab0] sm:$0xff] %v1185_v40  ;;  %v1191_v5 = vmul.f32 %v2249_v48, %v555_v46  ;;  %v1192_v42 = vmul.f32 %v2252_v49, %v556_v41  ;;  %v558_v1 = vld [vmem:[%s2150_s4 + $0xaf8] sm:$0xff] }
 0x120   : > { %1570 = vst [vmem:[%s2223_s18 + $0xab8] sm:$0xff] %v1186_v18  ;;  %1571 = vst [vmem:[%s2223_s18 + $0xac0] sm:$0xff] %v1187_v20  ;;  %v1193_v43 = vmul.f32 %v2255_v50, %v557_v32  ;;  %v559_v44 = vld [vmem:[%s2150_s4 + $0xb00] sm:$0xff]  ;;  %v560_v31 = vld [vmem:[%s2150_s4 + $0xb08] sm:$0xff]  ;;  %v1194_v45 = vmul.f32 %v2258_v51, %v558_v1 }
 0x121   : > { %1572 = vst [vmem:[%s2223_s18 + $0xac8] sm:$0xff] %v1188_v55  ;;  %1573 = vst [vmem:[%s2223_s18 + $0xad0] sm:$0xff] %v1189_v24  ;;  %v1195_v48 = vmul.f32 %v2278_v10, %v559_v44  ;;  %v1196_v49 = vmul.f32 %v2281_v11, %v560_v31  ;;  %v561_v33 = vld [vmem:[%s2150_s4 + $0xb10] sm:$0xff]  ;;  %v562_v50 = vld [vmem:[%s2150_s4 + $0xb18] sm:$0xff] }
 0x122   : > { %1574 = vst [vmem:[%s2223_s18 + $0xad8] sm:$0xff] %v1190_v26  ;;  %v563_v61 = vld [vmem:[%s2150_s4 + $0xb20] sm:$0xff]  ;;  %1575 = vst [vmem:[%s2223_s18 + $0xae0] sm:$0xff] %v1191_v5  ;;  %v1197_v0 = vmul.f32 %v2284_v12, %v561_v33  ;;  %v1198_v51 = vmul.f32 %v2287_v15, %v562_v50  ;;  %v564_v62 = vld [vmem:[%s2150_s4 + $0xb28] sm:$0xff] }
 0x123   : > { %1576 = vst [vmem:[%s2223_s18 + $0xae8] sm:$0xff] %v1192_v42  ;;  %1577 = vst [vmem:[%s2223_s18 + $0xaf0] sm:$0xff] %v1193_v43  ;;  %v1199_v10 = vmul.f32 %v2297_v23, %v563_v61  ;;  %v565_v11 = vld [vmem:[%s2150_s4 + $0xb30] sm:$0xff]  ;;  %v566_v13 = vld [vmem:[%s2150_s4 + $0xb38] sm:$0xff]  ;;  %v1200_v14 = vmul.f32 %v2300_v25, %v564_v62 }
 0x124   : > { %1578 = vst [vmem:[%s2223_s18 + $0xaf8] sm:$0xff] %v1194_v45  ;;  %1579 = vst [vmem:[%s2223_s18 + $0xb00] sm:$0xff] %v1195_v48  ;;  %v1201_v12 = vmul.f32 %v2303_v27, %v565_v11  ;;  %v1202_v15 = vmul.f32 %v2306_v28, %v566_v13  ;;  %v567_v38 = vld [vmem:[%s2150_s4 + $0xb40] sm:$0xff]  ;;  %v568_v23 = vld [vmem:[%s2150_s4 + $0xb48] sm:$0xff] }
 0x125   : > { %1580 = vst [vmem:[%s2223_s18 + $0xb08] sm:$0xff] %v1196_v49  ;;  %v569_v16 = vld [vmem:[%s2150_s4 + $0xb50] sm:$0xff]  ;;  %1581 = vst [vmem:[%s2223_s18 + $0xb10] sm:$0xff] %v1197_v0  ;;  %v1203_v58 = vmul.f32 %v2326_v47, %v567_v38  ;;  %v1204_v25 = vmul.f32 %v3612_v4, %v568_v23  ;;  %v570_v40 = vld [vmem:[%s2150_s4 + $0xb58] sm:$0xff] }
 0x126   : > { %1582 = vst [vmem:[%s2223_s18 + $0xb18] sm:$0xff] %v1198_v51  ;;  %1583 = vst [vmem:[%s2223_s18 + $0xb20] sm:$0xff] %v1199_v10  ;;  %v1205_v27 = vmul.f32 %v3613_v6, %v569_v16  ;;  %v571_v28 = vld [vmem:[%s2150_s4 + $0xb60] sm:$0xff]  ;;  %v572_v18 = vld [vmem:[%s2150_s4 + $0xb68] sm:$0xff]  ;;  %v1206_v20 = vmul.f32 %v3630_v29, %v570_v40 }
 0x127   : > { %1584 = vst [vmem:[%s2223_s18 + $0xb28] sm:$0xff] %v1200_v14  ;;  %1585 = vst [vmem:[%s2223_s18 + $0xb30] sm:$0xff] %v1201_v12  ;;  %v1207_v47 = vmul.f32 %v3615_v8, %v571_v28  ;;  %v1208_v4 = vmul.f32 %v3616_v9, %v572_v18  ;;  %v573_v6 = vld [vmem:[%s2150_s4 + $0xb70] sm:$0xff]  ;;  %v574_v39 = vld [vmem:[%s2150_s4 + $0xb78] sm:$0xff] }
 0x128   : > { %1586 = vst [vmem:[%s2223_s18 + $0xb38] sm:$0xff] %v1202_v15  ;;  %v575_v22 = vld [vmem:[%s2150_s4 + $0xb80] sm:$0xff]  ;;  %1587 = vst [vmem:[%s2223_s18 + $0xb40] sm:$0xff] %v1203_v58  ;;  %v1209_v34 = vmul.f32 %v3631_v59, %v573_v6  ;;  %v1210_v29 = vmul.f32 %v3632_v21, %v574_v39  ;;  %v576_v9 = vld [vmem:[%s2150_s4 + $0xb88] sm:$0xff] }
 0x129   : > { %1588 = vst [vmem:[%s2223_s18 + $0xb48] sm:$0xff] %v1204_v25  ;;  %1589 = vst [vmem:[%s2223_s18 + $0xb50] sm:$0xff] %v1205_v27  ;;  %v1211_v8 = vmul.f32 %v2375_v37, %v575_v22  ;;  %v577_v55 = vld [vmem:[%s2150_s4 + $0xb90] sm:$0xff]  ;;  %v578_v24 = vld [vmem:[%s2150_s4 + $0xb98] sm:$0xff]  ;;  %v1212_v59 = vmul.f32 %v3633_v63, %v576_v9 }
 0x12a   : > { %1590 = vst [vmem:[%s2223_s18 + $0xb58] sm:$0xff] %v1206_v20  ;;  %1591 = vst [vmem:[%s2223_s18 + $0xb60] sm:$0xff] %v1207_v47  ;;  %v1213_v21 = vmul.f32 %v3634_v53, %v577_v55  ;;  %v1214_v37 = vmul.f32 %v3635_v19, %v578_v24  ;;  %v579_v26 = vld [vmem:[%s2150_s4 + $0xba0] sm:$0xff]  ;;  %v580_v46 = vld [vmem:[%s2150_s4 + $0xba8] sm:$0xff] }
 0x12b   : > { %1592 = vst [vmem:[%s2223_s18 + $0xb68] sm:$0xff] %v1208_v4  ;;  %v581_v41 = vld [vmem:[%s2150_s4 + $0xbb0] sm:$0xff]  ;;  %1593 = vst [vmem:[%s2223_s18 + $0xb70] sm:$0xff] %v1209_v34  ;;  %v1215_v63 = vmul.f32 %v3622_v54, %v579_v26  ;;  %v1216_v53 = vmul.f32 %v3623_v60, %v580_v46  ;;  %v582_v32 = vld [vmem:[%s2150_s4 + $0xbb8] sm:$0xff] }
 0x12c   : > { %1594 = vst [vmem:[%s2223_s18 + $0xb78] sm:$0xff] %v1210_v29  ;;  %1595 = vst [vmem:[%s2223_s18 + $0xb80] sm:$0xff] %v1211_v8  ;;  %v1217_v19 = vmul.f32 %v3624_v30, %v581_v41  ;;  %v583_v5 = vld [vmem:[%s2150_s4 + $0xbc0] sm:$0xff]  ;;  %v584_v42 = vld [vmem:[%s2150_s4 + $0xbc8] sm:$0xff]  ;;  %v1218_v43 = vmul.f32 %v3636_v17, %v582_v32 }
 0x12d   : > { %1596 = vst [vmem:[%s2223_s18 + $0xb88] sm:$0xff] %v1212_v59  ;;  %1597 = vst [vmem:[%s2223_s18 + $0xb90] sm:$0xff] %v1213_v21  ;;  %v1219_v54 = vmul.f32 %v2429_v35, %v583_v5  ;;  %v1220_v60 = vmul.f32 %v2432_v36, %v584_v42  ;;  %v585_v30 = vld [vmem:[%s2150_s4 + $0xbd0] sm:$0xff]  ;;  %v586_v1 = vld [vmem:[%s2150_s4 + $0xbd8] sm:$0xff] }
 0x12e   : > { %1598 = vst [vmem:[%s2223_s18 + $0xb98] sm:$0xff] %v1214_v37  ;;  %v587_v44 = vld [vmem:[%s2150_s4 + $0xbe0] sm:$0xff]  ;;  %1599 = vst [vmem:[%s2223_s18 + $0xba0] sm:$0xff] %v1215_v63  ;;  %v1221_v31 = vmul.f32 %v3626_v56, %v585_v30  ;;  %v1222_v17 = vmul.f32 %v3637_v52, %v586_v1  ;;  %v588_v36 = vld [vmem:[%s2150_s4 + $0xbe8] sm:$0xff] }
 0x12f   : > { %1600 = vst [vmem:[%s2223_s18 + $0xba8] sm:$0xff] %v1216_v53  ;;  %1601 = vst [vmem:[%s2223_s18 + $0xbb0] sm:$0xff] %v1217_v19  ;;  %v1223_v35 = vmul.f32 %v2449_v2, %v587_v44  ;;  %v589_v45 = vld [vmem:[%s2150_s4 + $0xbf0] sm:$0xff]  ;;  %v590_v48 = vld [vmem:[%s2150_s4 + $0xbf8] sm:$0xff]  ;;  %v1224_v2 = vmul.f32 %v2452_v3, %v588_v36 }
 0x130   : > { %1602 = vst [vmem:[%s2223_s18 + $0xbb8] sm:$0xff] %v1218_v43  ;;  %1603 = vst [vmem:[%s2223_s18 + $0xbc0] sm:$0xff] %v1219_v54  ;;  %v1225_v56 = vmul.f32 %v3628_v57, %v589_v45  ;;  %v1226_v52 = vmul.f32 %v3629_v7, %v590_v48 }
 0x131   : > { %1604 = vst [vmem:[%s2223_s18 + $0xbc8] sm:$0xff] %v1220_v60  ;;  %1605 = vst [vmem:[%s2223_s18 + $0xbd0] sm:$0xff] %v1221_v31 }
 0x132   : > { %1606 = vst [vmem:[%s2223_s18 + $0xbd8] sm:$0xff] %v1222_v17  ;;  %1607 = vst [vmem:[%s2223_s18 + $0xbe0] sm:$0xff] %v1223_v35 }
 0x133   : > { %1608 = vst [vmem:[%s2223_s18 + $0xbe8] sm:$0xff] %v1224_v2  ;;  %1609 = vst [vmem:[%s2223_s18 + $0xbf0] sm:$0xff] %v1225_v56 }
 0x134   : > { %1610 = vst [vmem:[%s2223_s18 + $0xbf8] sm:$0xff] %v1226_v52 }
 0x135   : > { %1894 = shalt.err (!%p1891_p7)
}
 0x136   : > { %s1895_s27 = scalar_lea.hbm %s3471_s15, 49152  ;;  %s1899_s16 = scalar_lea.hbm %s3537_s2, 196608 }
 0x137   : > { %p1896_p1 = scmp.ne.s32.totalorder %s3471_s15, %s1895_s27  ;;  %p1900_p12 = scmp.lt.u32.totalorder %s3471_s15, %s3537_s2 }
 0x138   : > { %p1901_p2 = scmp.lt.u32.totalorder %s1899_s16, %s1895_s27  ;;  %p1903_p6 = scmp.lt.u32.totalorder %s1895_s27, %s3471_s15 }
 0x139   : > { %p1897_p4 = pnand %p1896_p1, %p3638_p10 }
 0x13a   : > { %p1902_p8 = por %p1901_p2, %p1900_p12 }
 0x13b   : > { %p1898_p5 = pneg %p1897_p4 }
 0x13c   : > { %p1904_p11 = por %p1903_p6, %p1902_p8 }
 0x13e   : > { %p1905_p13 = pnand %p1904_p11, %p1898_p5 }
 0x140   : > { %1908 = shalt.err (!%p1905_p13)
}
 0x141   : > { %s1974_s4 = smov 6144   ;;  %s1975_s18 = smov 384  }
 0x142   : > { %1752 = dma.vmem_to_hbm [thread:$0]  (%p3638_p10), %s3475_s23, 49152, %s3471_s15, %s1612_s12, %s1974_s4, %s1974_s4, %s1975_s18  }
 0x143 PF: > { %p1769_p0 = scmp.ge.s32.totalorder %s1967_s14, 2  ;;  %s1643_s20 = sand.u32 1, %s1947_s9  }
 0x144   : > { %p3639_p9 = scmp.ne.s32.totalorder %s3584_s22, 0  ;;  %s1644_s26 = scalar_lea.sflag [#allocation4], %s1643_s20 }
 0x146   : > { %p1763_p3 = pnand %p1769_p0, %p3639_p9 }
 0x148   : > { %1942 = dma.done.wait (!%p1763_p3), %s1644_s26, 49152  }
 0x149   : > { %1944 = vsyncadd (!%p1763_p3), %s1644_s26, 4294918144  ;;  %s19_s14 = sadd.s32 1, %s1967_s14   ;;  %s3640_s9 = smov %s1951_s10 }
 0x14a   : > { %p16_p7 = scmp.ge.s32.totalorder %s19_s14, 6   ;;  %s3641_s10 = smov %s1955_s11 }
 0x14b   : > { %s3642_s11 = smov %s2109_s25  ;;  %s3643_s12 = smov %s1963_s13 }
 0x14c   : > { %s3644_s13 = smov %s3646_s28  ;;  %18 = sbr.rel (!%p16_p7) target bundleno = 7 (0x7), region = 78 }
 0x153   :  { %1649 = vsyncpa [#allocation3], 1 }
 0x154   :  { %1651 = vsyncpa [#allocation3 + $0x1], 1 }
 0x155   :  { %1652 = vsyncpa [#allocation6], 1 }
 0x156   :  { %1653 = vsyncpa [#allocation4], 1 }
 0x157   :  { %1655 = vsyncpa [#allocation4 + $0x1], 1 }

</bundles_post_ra>
